<compile_context>
chip_gen: v5e
topology: v5e:2x2
jax: 0.10.0
libtpu: 0.0.40
codegen_flags: <defaults>
</compile_context>

<pallas_src>
import numpy as np
import jax
import jax.numpy as jnp
from jax import lax
from jax.experimental import pallas as pl
from jax.experimental.pallas import tpu as pltpu

NEG_SLOPE = 0.2
EPS = 1e-8  # AdaIN passes eps=1e-8 to F.instance_norm


def _round_up(n, m):
    return ((n + m - 1) // m) * m


def _nbytes(a):
    return int(a.size) * a.dtype.itemsize


def _make_shift_mats():
    # S[k, q, p] = 1 iff spatial position q is the k-th (3x3, pad=1) neighbour of p,
    # with k = dy*3 + dx and positions flattened as h*4 + w (row-major, NCHW).
    S = np.zeros((9, 16, 16), np.float32)
    for dy in range(3):
        for dx in range(3):
            k = dy * 3 + dx
            for h in range(4):
                for w in range(4):
                    sh, sw = h + dy - 1, w + dx - 1
                    if 0 <= sh < 4 and 0 <= sw < 4:
                        S[k, sh * 4 + sw, h * 4 + w] = 1.0
    return S


def _make_block_shift_mats(tb):
    # [9, tb*16, tb*16]: block-diag I_tb kron S[k] — entries 0/1, exact in bf16.
    S = _make_shift_mats()
    eye = np.eye(tb, dtype=np.float32)
    return np.stack([np.kron(eye, S[k]) for k in range(9)], axis=0)


def _make_pool_mat(tb):
    # [tb*16, tb*16]: per-sample mean pool, I_tb kron (J16 / 16).
    return np.kron(np.eye(tb, dtype=np.float32),
                   np.full((16, 16), 1.0 / 16.0, np.float32))


def _make_expand_mat(tb):
    # [tb, tb*16]: E[s, s*16 + j] = 1 — broadcasts one per-sample scalar to its 16 lanes.
    E = np.zeros((tb, tb * 16), np.float32)
    for s in range(tb):
        E[s, s * 16:(s + 1) * 16] = 1.0
    return E


def _leaky(x):
    return jnp.where(x >= 0, x, NEG_SLOPE * x)


def _synth_kernel(base_ref, noise_ref, ns1_ref, ns2_ref,
                  aff1_ref, aff2_ref, cw_ref, cb_ref,
                  shift_ref, pool_ref, expand_ref, out_ref):
    bf16 = jnp.bfloat16

    def inst_norm(v):
        # per-sample (16-lane block) instance norm: one fused [2C, lanes] @ pool
        # matmul yields mean and E[v^2]; var = E[v^2] - mean^2 (clamped), eps=1e-8.
        c = v.shape[0]
        stats = jnp.dot(jnp.concatenate([v, v * v], axis=0), pool_ref[...],
                        preferred_element_type=jnp.float32)          # [2C, lanes]
        m = stats[:c, :]
        var = jnp.maximum(stats[c:, :] - m * m, 0.0)
        return (v - m) * lax.rsqrt(var + EPS)

    def adain(vn, aff_ref):
        # aff rows [0:C] = per-sample scale, rows [C:2C] = per-sample bias; a single
        # [2C, tb] @ [tb, lanes] matmul lane-broadcasts both, then row-slice.
        c = vn.shape[0]
        sb = jnp.dot(aff_ref[...], expand_ref[...],
                     preferred_element_type=jnp.float32)             # [2C, lanes]
        return sb[:c, :] * vn + sb[c:, :]

    # ---- noise1 + leaky relu + adain1 on the broadcast base image ----
    x = base_ref[...] + noise_ref[0:1, :] * ns1_ref[...]             # [C0, lanes] f32
    x = adain(inst_norm(_leaky(x)), aff1_ref)

    # ---- 3x3 conv, stride 1, pad 1 ("shift-first", weight pre-scaled in wrapper) ----
    # 9 shifted copies via exact 0/1 shift matrices (bf16, lossless), stacked on
    # sublanes, then ONE bf16 weight matmul [C1, 9*C0] @ [9*C0, lanes], f32 accum.
    # (The zeros-init accumulator + 9 adds of the old version are gone entirely.)
    xb = x.astype(bf16)
    xs = jnp.concatenate(
        [jnp.dot(xb, shift_ref[k], preferred_element_type=jnp.float32)
         for k in range(9)], axis=0).astype(bf16)                    # [9*C0, lanes]
    y = jnp.dot(cw_ref[...], xs, preferred_element_type=jnp.float32) + cb_ref[...]

    # ---- noise2 + leaky relu + adain2 ----
    y = y + noise_ref[1:2, :] * ns2_ref[...]
    out_ref[...] = adain(inst_norm(_leaky(y)), aff2_ref)


def _pick_tb(batch_size):
    """Samples packed per grid step (lane axis width = tb*16)."""
    try:
        kind = jax.devices()[0].device_kind.lower()
    except Exception:
        kind = ""
    # v6e / v7x MXUs are 256 wide -> tb=16 (256 lanes); v5e (128-wide) / unknown -> 8.
    tb = 16 if ("v6" in kind or "v7" in kind or "trillium" in kind) else 8
    # v7x has 2 TensorCores: prefer >= 2 grid steps, but never drop below 128 lanes.
    if "v7" in kind and tb > 8 and pl.cdiv(batch_size, tb) < 2:
        tb = 8
    return tb


def synth_first_block(params, w1, w2, noise1, noise2, tb=None):
    """w1, w2: [B, w_dim] (the [B, w_dim, 1, 1] fed to the PyTorch module);
    noise1, noise2: [B, 16] (the per-sample randn([B,1,4,4]) of NoiseLayer)."""
    f32, bf16 = jnp.float32, jnp.bfloat16
    base = params["base"]                                # [C0, 16]
    conv_w, conv_b = params["conv_w"], params["conv_b"]  # [9, C1, C0], [C1, 1]
    ns1, ns2 = params["noise_scale1"], params["noise_scale2"]

    B, wd = w1.shape
    C0, C1 = base.shape[0], conv_w.shape[1]
    # Channel dims padded to multiples of 16: every row slice / concat in the kernel
    # then lands on (8,128) f32 and (16,128) bf16 tile boundaries.
    C0p, C1p = _round_up(C0, 16), _round_up(C1, 16)

    if tb is None:
        tb = _pick_tb(B)
    tb = max(1, min(int(tb), 16))
    Bp = _round_up(B, tb)
    G = Bp // tb
    lanes = tb * 16
    pad = Bp - B

    w1p = jnp.pad(w1.astype(f32), ((0, pad), (0, 0)))
    w2p = jnp.pad(w2.astype(f32), ((0, pad), (0, 0)))
    n1p = jnp.pad(noise1.astype(f32), ((0, pad), (0, 0)))
    n2p = jnp.pad(noise2.astype(f32), ((0, pad), (0, 0)))

    # WSConv2d scales folded outside the kernel (no per-step rescale).
    adain_ws_scale = 1.0 / np.sqrt(wd)                   # gain=1, k=1
    conv_ws_scale = np.sqrt(2.0) / np.sqrt(C0 * 9)       # gain=sqrt(2), k=3

    # AdaIN affine coefficients precomputed per sample (tiny matmuls in XLA),
    # packed per grid step as [G, 2*Cp, tb]: rows [0:Cp] = scale, [Cp:2Cp] = bias.
    def affine(wlat, wmat, wbias):
        return (wlat * adain_ws_scale) @ wmat.astype(f32).T + wbias.astype(f32)[:, 0][None, :]

    def pack_affine(scale, bias, cp):
        def pk(a):
            a = jnp.pad(a, ((0, 0), (0, cp - a.shape[1])))           # [Bp, Cp]
            return a.reshape(G, tb, cp).transpose(0, 2, 1)           # [G, Cp, tb]
        return jnp.concatenate([pk(scale), pk(bias)], axis=1)        # [G, 2Cp, tb]

    aff1 = pack_affine(affine(w1p, params["adain1_scale_w"], params["adain1_scale_b"]),
                       affine(w1p, params["adain1_bias_w"], params["adain1_bias_b"]), C0p)
    aff2 = pack_affine(affine(w2p, params["adain2_scale_w"], params["adain2_scale_b"]),
                       affine(w2p, params["adain2_bias_w"], params["adain2_bias_b"]), C1p)

    # Noise packed per grid step: [G, 2, lanes] (sample s owns lanes s*16 .. s*16+15).
    noise = jnp.stack([n1p.reshape(G, lanes), n2p.reshape(G, lanes)], axis=1)

    # Constants (constant block index -> fetched once, not re-DMA'd per grid step).
    base_tiled = jnp.tile(jnp.pad(base.astype(f32), ((0, C0p - C0), (0, 0))), (1, tb))
    ns1p = jnp.pad(ns1.astype(f32), ((0, C0p - C0), (0, 0)))
    ns2p = jnp.pad(ns2.astype(f32), ((0, C1p - C1), (0, 0)))
    cbp = jnp.pad(conv_b.astype(f32), ((0, C1p - C1), (0, 0)))
    cw_p = jnp.pad(conv_w.astype(f32) * conv_ws_scale,
                   ((0, 0), (0, C1p - C1), (0, C0p - C0)))           # [9, C1p, C0p]
    # "shift-first" stacked weight: Wbig[c, k*C0p + i] = W[k, c, i]  (bf16 MXU operand)
    cw = jnp.transpose(cw_p, (1, 0, 2)).reshape(C1p, 9 * C0p).astype(bf16)
    shifts = jnp.asarray(_make_block_shift_mats(tb), dtype=bf16)     # [9, lanes, lanes]
    pool = jnp.asarray(_make_pool_mat(tb))                           # [lanes, lanes] f32
    expand = jnp.asarray(_make_expand_mat(tb))                       # [tb, lanes]    f32

    def per_step(shape):
        n = len(shape)
        return pl.BlockSpec((None,) + shape, lambda g, _n=n: (g,) + (0,) * _n)

    def build_call(single_buffer_consts):
        def const(shape):
            n = len(shape)
            idx = lambda g, _n=n: (0,) * _n
            if single_buffer_consts:
                # constants are fetched once; skip the second pipeline buffer.
                return pl.BlockSpec(shape, idx, pipeline_mode=pl.Buffered(buffer_count=1))
            return pl.BlockSpec(shape, idx)

        in_specs = [
            const((C0p, lanes)),         # base image tiled along lanes
            per_step((2, lanes)),        # noise1 / noise2 packed
            const((C0p, 1)),             # noise_scale1
            const((C1p, 1)),             # noise_scale2
            per_step((2 * C0p, tb)),     # adain1 per-sample scale/bias coefficients
            per_step((2 * C1p, tb)),     # adain2 per-sample scale/bias coefficients
            const((C1p, 9 * C0p)),       # stacked, pre-scaled conv weight (bf16)
            const((C1p, 1)),             # conv bias
            const((9, lanes, lanes)),    # block-diag spatial shift matrices (bf16)
            const((lanes, lanes)),       # per-sample mean-pool matrix (f32)
            const((tb, lanes)),          # per-sample lane-broadcast matrix (f32)
        ]
        # Explicit VMEM budget: constants (1 or 2 buffers) + double-buffered
        # per-step blocks + in-kernel temps, capped below every gen's physical VMEM.
        const_bytes = sum(_nbytes(a) for a in
                          (base_tiled, ns1p, ns2p, cw, cbp, shifts, pool, expand))
        step_bytes = 2 * (_nbytes(noise) + _nbytes(aff1) + _nbytes(aff2)) // max(G, 1) \
                     + 2 * C1p * lanes * 4
        temp_bytes = 9 * C0p * lanes * 6 + 8 * (C0p + C1p) * lanes * 4
        vmem_limit = int(min(56 << 20,
                             max(16 << 20,
                                 (1 if single_buffer_consts else 2) * const_bytes
                                 + step_bytes + temp_bytes + (4 << 20))))
        return pl.pallas_call(
            _synth_kernel,
            out_shape=jax.ShapeDtypeStruct((G, C1p, lanes), f32),
            grid=(G,),
            in_specs=in_specs,
            out_specs=pl.BlockSpec((None, C1p, lanes), lambda g: (g, 0, 0)),
            compiler_params=pltpu.CompilerParams(
                dimension_semantics=("parallel",),
                vmem_limit_bytes=vmem_limit),
        )(base_tiled, noise, ns1p, ns2p, aff1, aff2, cw, cbp, shifts, pool, expand)

    try:
        out = build_call(True)
    except Exception:
        # This jax build rejected pl.Buffered(1) -> fall back to default buffering.
        out = build_call(False)

    # [G, C1p, tb, 16] -> [Bp, C1p, 16] -> [B, C1, 4, 4]  (NCHW, matching PyTorch).
    # Downstream consumers could take the packed [B, C1, 16] layout and skip this.
    out = out.reshape(G, C1p, tb, 16).transpose(0, 2, 1, 3).reshape(Bp, C1p, 16)
    return out[:B, :C1].reshape(B, C1, 4, 4)


def init_params(key, start_dim, output_dim, w_dim):
    ks = jax.random.split(key, 8)
    f32 = jnp.float32
    # base_image_init == 'one_normal'
    base = jax.random.normal(ks[0], (start_dim, 16), f32) + 1.0
    # conv weight in torch layout [O, I, 3, 3] -> [9, O, I] with k = dy*3 + dx
    conv_w_t = jax.random.normal(ks[1], (output_dim, start_dim, 3, 3), f32)
    conv_w = jnp.transpose(conv_w_t, (2, 3, 0, 1)).reshape(9, output_dim, start_dim)
    return dict(
        base=base,
        conv_w=conv_w,
        conv_b=jnp.zeros((output_dim, 1), f32),
        adain1_scale_w=jax.random.normal(ks[2], (start_dim, w_dim), f32),
        adain1_scale_b=jnp.zeros((start_dim, 1), f32),
        adain1_bias_w=jax.random.normal(ks[3], (start_dim, w_dim), f32),
        adain1_bias_b=jnp.zeros((start_dim, 1), f32),
        adain2_scale_w=jax.random.normal(ks[4], (output_dim, w_dim), f32),
        adain2_scale_b=jnp.zeros((output_dim, 1), f32),
        adain2_bias_w=jax.random.normal(ks[5], (output_dim, w_dim), f32),
        adain2_bias_b=jnp.zeros((output_dim, 1), f32),
        # module init is zeros; use small deterministic values so the noise path matters
        noise_scale1=0.1 * jax.random.normal(ks[6], (start_dim, 1), f32),
        noise_scale2=0.1 * jax.random.normal(ks[7], (output_dim, 1), f32),
    )


def ref_forward(params, w1, w2, noise1, noise2):
    # pure-JAX f32 reference of the PyTorch forward
    base = params["base"]
    B, wd = w1.shape
    C0 = base.shape[0]
    C1 = params["conv_w"].shape[1]
    sA = 1.0 / np.sqrt(wd)
    cS = np.sqrt(2.0) / np.sqrt(C0 * 9)
    shift = jnp.asarray(_make_shift_mats())

    x = base[None] + noise1[:, None, :] * params["noise_scale1"][None]     # [B,C0,16]
    x = jnp.where(x >= 0, x, NEG_SLOPE * x)
    m = x.mean(-1, keepdims=True); v = ((x - m) ** 2).mean(-1, keepdims=True)
    xn = (x - m) * lax.rsqrt(v + EPS)
    s1 = jnp.einsum("cw,bw->bc", params["adain1_scale_w"] * sA, w1)[..., None] + params["adain1_scale_b"][None]
    b1 = jnp.einsum("cw,bw->bc", params["adain1_bias_w"] * sA, w1)[..., None] + params["adain1_bias_b"][None]
    x = s1 * xn + b1

    y = jnp.einsum("koc,bcq,kqp->bop", params["conv_w"] * cS, x, shift) + params["conv_b"][None]
    y = y + noise2[:, None, :] * params["noise_scale2"][None]
    y = jnp.where(y >= 0, y, NEG_SLOPE * y)
    m2 = y.mean(-1, keepdims=True); v2 = ((y - m2) ** 2).mean(-1, keepdims=True)
    yn = (y - m2) * lax.rsqrt(v2 + EPS)
    s2 = jnp.einsum("cw,bw->bc", params["adain2_scale_w"] * sA, w2)[..., None] + params["adain2_scale_b"][None]
    b2 = jnp.einsum("cw,bw->bc", params["adain2_bias_w"] * sA, w2)[..., None] + params["adain2_bias_b"][None]
    return (s2 * yn + b2).reshape(B, C1, 4, 4)


if __name__ == "__main__":
    key = jax.random.PRNGKey(0)
    B, start_dim, output_dim, w_dim = 2, 8, 16, 8
    kp, kw1, kw2, kn1, kn2 = jax.random.split(key, 5)

    params = init_params(kp, start_dim, output_dim, w_dim)
    w1 = jax.random.normal(kw1, (B, w_dim), jnp.float32)      # latent for adain1
    w2 = jax.random.normal(kw2, (B, w_dim), jnp.float32)      # latent for adain2
    # NoiseLayer draws torch.randn([B,1,4,4]); generated here deterministically.
    noise1 = jax.random.normal(kn1, (B, 16), jnp.float32)
    noise2 = jax.random.normal(kn2, (B, 16), jnp.float32)

    out = synth_first_block(params, w1, w2, noise1, noise2)   # tb auto-picked per device
    out = jax.block_until_ready(out)

    ref = ref_forward(params, w1, w2, noise1, noise2)
    assert out.shape == (B, output_dim, 4, 4)
    # The conv path runs with bf16 MXU operands (f32 accumulation); tolerance sized
    # for bf16 operand rounding vs the pure-f32 reference.
    np.testing.assert_allclose(np.asarray(out), np.asarray(ref), rtol=2e-2, atol=5e-2)
    print("KERNEL_OK")
</pallas_src>

<mosaic_0001>
module attributes {stable_mosaic.version = 11 : i64} {
  func.func @_synth_kernel(%arg0: i32, %arg1: memref<16x128xf32, #tpu.memory_space<vmem>>, %arg2: memref<1x2x128xf32, #tpu.memory_space<vmem>>, %arg3: memref<16x1xf32, #tpu.memory_space<vmem>>, %arg4: memref<16x1xf32, #tpu.memory_space<vmem>>, %arg5: memref<1x32x8xf32, #tpu.memory_space<vmem>>, %arg6: memref<1x32x8xf32, #tpu.memory_space<vmem>>, %arg7: memref<16x144xbf16, #tpu.memory_space<vmem>>, %arg8: memref<16x1xf32, #tpu.memory_space<vmem>>, %arg9: memref<9x128x128xbf16, #tpu.memory_space<vmem>>, %arg10: memref<128x128xf32, #tpu.memory_space<vmem>>, %arg11: memref<8x128xf32, #tpu.memory_space<vmem>>, %arg12: memref<1x16x128xf32, #tpu.memory_space<vmem>>) attributes {dimension_semantics = [#tpu.dimension_semantics<parallel>], iteration_bounds = array<i64: 1>, scalar_prefetch = 0 : i64, scratch_operands = 0 : i64, tpu.core_type = #tpu.core_type<tc>, window_params = [{pipeline_mode = #tpu.pipeline_mode<synchronous>, transform_indices = @transform_0, window_bounds = array<i64: 16, 128>}, {transform_indices = @transform_1, window_bounds = array<i64: 1, 2, 128>}, {pipeline_mode = #tpu.pipeline_mode<synchronous>, transform_indices = @transform_2, window_bounds = array<i64: 16, 1>}, {pipeline_mode = #tpu.pipeline_mode<synchronous>, transform_indices = @transform_3, window_bounds = array<i64: 16, 1>}, {transform_indices = @transform_4, window_bounds = array<i64: 1, 32, 8>}, {transform_indices = @transform_5, window_bounds = array<i64: 1, 32, 8>}, {pipeline_mode = #tpu.pipeline_mode<synchronous>, transform_indices = @transform_6, window_bounds = array<i64: 16, 144>}, {pipeline_mode = #tpu.pipeline_mode<synchronous>, transform_indices = @transform_7, window_bounds = array<i64: 16, 1>}, {pipeline_mode = #tpu.pipeline_mode<synchronous>, transform_indices = @transform_8, window_bounds = array<i64: 9, 128, 128>}, {pipeline_mode = #tpu.pipeline_mode<synchronous>, transform_indices = @transform_9, window_bounds = array<i64: 128, 128>}, {pipeline_mode = #tpu.pipeline_mode<synchronous>, transform_indices = @transform_10, window_bounds = array<i64: 8, 128>}, {transform_indices = @transform_11, window_bounds = array<i64: 1, 16, 128>}]} {
    %c0 = arith.constant 0 : index
    %c0_0 = arith.constant 0 : index
    %0 = vector.load %arg1[%c0, %c0_0] : memref<16x128xf32, #tpu.memory_space<vmem>>, vector<16x128xf32>
    %c0_1 = arith.constant 0 : index
    %c0_2 = arith.constant 0 : index
    %c0_3 = arith.constant 0 : index
    %1 = vector.load %arg2[%c0_1, %c0_2, %c0_3] : memref<1x2x128xf32, #tpu.memory_space<vmem>>, vector<1x1x128xf32>
    %2 = vector.shape_cast %1 : vector<1x1x128xf32> to vector<1x128xf32>
    %c0_4 = arith.constant 0 : index
    %c0_5 = arith.constant 0 : index
    %3 = vector.load %arg3[%c0_4, %c0_5] : memref<16x1xf32, #tpu.memory_space<vmem>>, vector<16x1xf32>
    %4 = vector.broadcast %2 : vector<1x128xf32> to vector<16x128xf32>
    %5 = vector.broadcast %3 : vector<16x1xf32> to vector<16x128xf32>
    %6 = arith.mulf %4, %5 : vector<16x128xf32>
    %7 = arith.addf %0, %6 : vector<16x128xf32>
    %cst = arith.constant 0.000000e+00 : f32
    %8 = vector.broadcast %cst : f32 to vector<16x128xf32>
    %9 = arith.cmpf oge, %7, %8 : vector<16x128xf32>
    %cst_6 = arith.constant 2.000000e-01 : f32
    %10 = vector.broadcast %cst_6 : f32 to vector<16x128xf32>
    %11 = arith.mulf %10, %7 : vector<16x128xf32>
    %12 = arith.select %9, %7, %11 : vector<16x128xi1>, vector<16x128xf32>
    %13 = arith.mulf %12, %12 : vector<16x128xf32>
    %14 = tpu.concatenate %12, %13 in 0 : vector<16x128xf32>, vector<16x128xf32> -> vector<32x128xf32>
    %c0_7 = arith.constant 0 : index
    %c0_8 = arith.constant 0 : index
    %15 = vector.load %arg10[%c0_7, %c0_8] : memref<128x128xf32, #tpu.memory_space<vmem>>, vector<128x128xf32>
    %cst_9 = arith.constant dense<0.000000e+00> : vector<32x128xf32>
    %16 = tpu.matmul %14, %15, %cst_9 {dimension_numbers = #tpu.dot_dimension_numbers<[1], [0], [0], [1], [0, 0, 1, 1], [], []>} : vector<32x128xf32>, vector<128x128xf32>, vector<32x128xf32> -> vector<32x128xf32>
    %17 = vector.extract_strided_slice %16 {offsets = [0, 0], sizes = [16, 128], strides = [1, 1]} : vector<32x128xf32> to vector<16x128xf32>
    %18 = vector.extract_strided_slice %16 {offsets = [16, 0], sizes = [16, 128], strides = [1, 1]} : vector<32x128xf32> to vector<16x128xf32>
    %19 = arith.mulf %17, %17 : vector<16x128xf32>
    %20 = arith.subf %18, %19 : vector<16x128xf32>
    %cst_10 = arith.constant 0.000000e+00 : f32
    %21 = vector.broadcast %cst_10 : f32 to vector<16x128xf32>
    %22 = arith.maximumf %20, %21 : vector<16x128xf32>
    %23 = arith.subf %12, %17 : vector<16x128xf32>
    %cst_11 = arith.constant 9.99999993E-9 : f32
    %24 = vector.broadcast %cst_11 : f32 to vector<16x128xf32>
    %25 = arith.addf %22, %24 : vector<16x128xf32>
    %26 = math.rsqrt %25 : vector<16x128xf32>
    %27 = arith.mulf %23, %26 : vector<16x128xf32>
    %c0_12 = arith.constant 0 : index
    %c0_13 = arith.constant 0 : index
    %c0_14 = arith.constant 0 : index
    %28 = vector.load %arg5[%c0_12, %c0_13, %c0_14] : memref<1x32x8xf32, #tpu.memory_space<vmem>>, vector<1x32x8xf32>
    %29 = vector.shape_cast %28 : vector<1x32x8xf32> to vector<32x8xf32>
    %c0_15 = arith.constant 0 : index
    %c0_16 = arith.constant 0 : index
    %30 = vector.load %arg11[%c0_15, %c0_16] : memref<8x128xf32, #tpu.memory_space<vmem>>, vector<8x128xf32>
    %cst_17 = arith.constant dense<0.000000e+00> : vector<32x128xf32>
    %31 = tpu.matmul %29, %30, %cst_17 {dimension_numbers = #tpu.dot_dimension_numbers<[1], [0], [0], [1], [0, 0, 1, 1], [], []>} : vector<32x8xf32>, vector<8x128xf32>, vector<32x128xf32> -> vector<32x128xf32>
    %32 = vector.extract_strided_slice %31 {offsets = [0, 0], sizes = [16, 128], strides = [1, 1]} : vector<32x128xf32> to vector<16x128xf32>
    %33 = arith.mulf %32, %27 : vector<16x128xf32>
    %34 = vector.extract_strided_slice %31 {offsets = [16, 0], sizes = [16, 128], strides = [1, 1]} : vector<32x128xf32> to vector<16x128xf32>
    %35 = arith.addf %33, %34 : vector<16x128xf32>
    %36 = arith.truncf %35 : vector<16x128xf32> to vector<16x128xbf16>
    %c0_18 = arith.constant 0 : index
    %c0_19 = arith.constant 0 : index
    %c0_20 = arith.constant 0 : index
    %37 = vector.load %arg9[%c0_18, %c0_19, %c0_20] : memref<9x128x128xbf16, #tpu.memory_space<vmem>>, vector<1x128x128xbf16>
    %38 = vector.shape_cast %37 : vector<1x128x128xbf16> to vector<128x128xbf16>
    %cst_21 = arith.constant dense<0.000000e+00> : vector<16x128xf32>
    %39 = tpu.matmul %36, %38, %cst_21 {dimension_numbers = #tpu.dot_dimension_numbers<[1], [0], [0], [1], [0, 0, 1, 1], [], []>} : vector<16x128xbf16>, vector<128x128xbf16>, vector<16x128xf32> -> vector<16x128xf32>
    %c1 = arith.constant 1 : index
    %c0_22 = arith.constant 0 : index
    %c0_23 = arith.constant 0 : index
    %40 = vector.load %arg9[%c1, %c0_22, %c0_23] : memref<9x128x128xbf16, #tpu.memory_space<vmem>>, vector<1x128x128xbf16>
    %41 = vector.shape_cast %40 : vector<1x128x128xbf16> to vector<128x128xbf16>
    %cst_24 = arith.constant dense<0.000000e+00> : vector<16x128xf32>
    %42 = tpu.matmul %36, %41, %cst_24 {dimension_numbers = #tpu.dot_dimension_numbers<[1], [0], [0], [1], [0, 0, 1, 1], [], []>} : vector<16x128xbf16>, vector<128x128xbf16>, vector<16x128xf32> -> vector<16x128xf32>
    %c2 = arith.constant 2 : index
    %c0_25 = arith.constant 0 : index
    %c0_26 = arith.constant 0 : index
    %43 = vector.load %arg9[%c2, %c0_25, %c0_26] : memref<9x128x128xbf16, #tpu.memory_space<vmem>>, vector<1x128x128xbf16>
    %44 = vector.shape_cast %43 : vector<1x128x128xbf16> to vector<128x128xbf16>
    %cst_27 = arith.constant dense<0.000000e+00> : vector<16x128xf32>
    %45 = tpu.matmul %36, %44, %cst_27 {dimension_numbers = #tpu.dot_dimension_numbers<[1], [0], [0], [1], [0, 0, 1, 1], [], []>} : vector<16x128xbf16>, vector<128x128xbf16>, vector<16x128xf32> -> vector<16x128xf32>
    %c3 = arith.constant 3 : index
    %c0_28 = arith.constant 0 : index
    %c0_29 = arith.constant 0 : index
    %46 = vector.load %arg9[%c3, %c0_28, %c0_29] : memref<9x128x128xbf16, #tpu.memory_space<vmem>>, vector<1x128x128xbf16>
    %47 = vector.shape_cast %46 : vector<1x128x128xbf16> to vector<128x128xbf16>
    %cst_30 = arith.constant dense<0.000000e+00> : vector<16x128xf32>
    %48 = tpu.matmul %36, %47, %cst_30 {dimension_numbers = #tpu.dot_dimension_numbers<[1], [0], [0], [1], [0, 0, 1, 1], [], []>} : vector<16x128xbf16>, vector<128x128xbf16>, vector<16x128xf32> -> vector<16x128xf32>
    %c4 = arith.constant 4 : index
    %c0_31 = arith.constant 0 : index
    %c0_32 = arith.constant 0 : index
    %49 = vector.load %arg9[%c4, %c0_31, %c0_32] : memref<9x128x128xbf16, #tpu.memory_space<vmem>>, vector<1x128x128xbf16>
    %50 = vector.shape_cast %49 : vector<1x128x128xbf16> to vector<128x128xbf16>
    %cst_33 = arith.constant dense<0.000000e+00> : vector<16x128xf32>
    %51 = tpu.matmul %36, %50, %cst_33 {dimension_numbers = #tpu.dot_dimension_numbers<[1], [0], [0], [1], [0, 0, 1, 1], [], []>} : vector<16x128xbf16>, vector<128x128xbf16>, vector<16x128xf32> -> vector<16x128xf32>
    %c5 = arith.constant 5 : index
    %c0_34 = arith.constant 0 : index
    %c0_35 = arith.constant 0 : index
    %52 = vector.load %arg9[%c5, %c0_34, %c0_35] : memref<9x128x128xbf16, #tpu.memory_space<vmem>>, vector<1x128x128xbf16>
    %53 = vector.shape_cast %52 : vector<1x128x128xbf16> to vector<128x128xbf16>
    %cst_36 = arith.constant dense<0.000000e+00> : vector<16x128xf32>
    %54 = tpu.matmul %36, %53, %cst_36 {dimension_numbers = #tpu.dot_dimension_numbers<[1], [0], [0], [1], [0, 0, 1, 1], [], []>} : vector<16x128xbf16>, vector<128x128xbf16>, vector<16x128xf32> -> vector<16x128xf32>
    %c6 = arith.constant 6 : index
    %c0_37 = arith.constant 0 : index
    %c0_38 = arith.constant 0 : index
    %55 = vector.load %arg9[%c6, %c0_37, %c0_38] : memref<9x128x128xbf16, #tpu.memory_space<vmem>>, vector<1x128x128xbf16>
    %56 = vector.shape_cast %55 : vector<1x128x128xbf16> to vector<128x128xbf16>
    %cst_39 = arith.constant dense<0.000000e+00> : vector<16x128xf32>
    %57 = tpu.matmul %36, %56, %cst_39 {dimension_numbers = #tpu.dot_dimension_numbers<[1], [0], [0], [1], [0, 0, 1, 1], [], []>} : vector<16x128xbf16>, vector<128x128xbf16>, vector<16x128xf32> -> vector<16x128xf32>
    %c7 = arith.constant 7 : index
    %c0_40 = arith.constant 0 : index
    %c0_41 = arith.constant 0 : index
    %58 = vector.load %arg9[%c7, %c0_40, %c0_41] : memref<9x128x128xbf16, #tpu.memory_space<vmem>>, vector<1x128x128xbf16>
    %59 = vector.shape_cast %58 : vector<1x128x128xbf16> to vector<128x128xbf16>
    %cst_42 = arith.constant dense<0.000000e+00> : vector<16x128xf32>
    %60 = tpu.matmul %36, %59, %cst_42 {dimension_numbers = #tpu.dot_dimension_numbers<[1], [0], [0], [1], [0, 0, 1, 1], [], []>} : vector<16x128xbf16>, vector<128x128xbf16>, vector<16x128xf32> -> vector<16x128xf32>
    %c8 = arith.constant 8 : index
    %c0_43 = arith.constant 0 : index
    %c0_44 = arith.constant 0 : index
    %61 = vector.load %arg9[%c8, %c0_43, %c0_44] : memref<9x128x128xbf16, #tpu.memory_space<vmem>>, vector<1x128x128xbf16>
    %62 = vector.shape_cast %61 : vector<1x128x128xbf16> to vector<128x128xbf16>
    %cst_45 = arith.constant dense<0.000000e+00> : vector<16x128xf32>
    %63 = tpu.matmul %36, %62, %cst_45 {dimension_numbers = #tpu.dot_dimension_numbers<[1], [0], [0], [1], [0, 0, 1, 1], [], []>} : vector<16x128xbf16>, vector<128x128xbf16>, vector<16x128xf32> -> vector<16x128xf32>
    %64 = tpu.concatenate %39, %42, %45, %48, %51, %54, %57, %60, %63 in 0 : vector<16x128xf32>, vector<16x128xf32>, vector<16x128xf32>, vector<16x128xf32>, vector<16x128xf32>, vector<16x128xf32>, vector<16x128xf32>, vector<16x128xf32>, vector<16x128xf32> -> vector<144x128xf32>
    %65 = arith.truncf %64 : vector<144x128xf32> to vector<144x128xbf16>
    %c0_46 = arith.constant 0 : index
    %c0_47 = arith.constant 0 : index
    %66 = vector.load %arg7[%c0_46, %c0_47] : memref<16x144xbf16, #tpu.memory_space<vmem>>, vector<16x144xbf16>
    %cst_48 = arith.constant dense<0.000000e+00> : vector<16x128xf32>
    %67 = tpu.matmul %66, %65, %cst_48 {dimension_numbers = #tpu.dot_dimension_numbers<[1], [0], [0], [1], [0, 0, 1, 1], [], []>} : vector<16x144xbf16>, vector<144x128xbf16>, vector<16x128xf32> -> vector<16x128xf32>
    %c0_49 = arith.constant 0 : index
    %c0_50 = arith.constant 0 : index
    %68 = vector.load %arg8[%c0_49, %c0_50] : memref<16x1xf32, #tpu.memory_space<vmem>>, vector<16x1xf32>
    %69 = vector.broadcast %68 : vector<16x1xf32> to vector<16x128xf32>
    %70 = arith.addf %67, %69 : vector<16x128xf32>
    %c0_51 = arith.constant 0 : index
    %c1_52 = arith.constant 1 : index
    %c0_53 = arith.constant 0 : index
    %71 = vector.load %arg2[%c0_51, %c1_52, %c0_53] : memref<1x2x128xf32, #tpu.memory_space<vmem>>, vector<1x1x128xf32>
    %72 = vector.shape_cast %71 : vector<1x1x128xf32> to vector<1x128xf32>
    %c0_54 = arith.constant 0 : index
    %c0_55 = arith.constant 0 : index
    %73 = vector.load %arg4[%c0_54, %c0_55] : memref<16x1xf32, #tpu.memory_space<vmem>>, vector<16x1xf32>
    %74 = vector.broadcast %72 : vector<1x128xf32> to vector<16x128xf32>
    %75 = vector.broadcast %73 : vector<16x1xf32> to vector<16x128xf32>
    %76 = arith.mulf %74, %75 : vector<16x128xf32>
    %77 = arith.addf %70, %76 : vector<16x128xf32>
    %cst_56 = arith.constant 0.000000e+00 : f32
    %78 = vector.broadcast %cst_56 : f32 to vector<16x128xf32>
    %79 = arith.cmpf oge, %77, %78 : vector<16x128xf32>
    %cst_57 = arith.constant 2.000000e-01 : f32
    %80 = vector.broadcast %cst_57 : f32 to vector<16x128xf32>
    %81 = arith.mulf %80, %77 : vector<16x128xf32>
    %82 = arith.select %79, %77, %81 : vector<16x128xi1>, vector<16x128xf32>
    %83 = arith.mulf %82, %82 : vector<16x128xf32>
    %84 = tpu.concatenate %82, %83 in 0 : vector<16x128xf32>, vector<16x128xf32> -> vector<32x128xf32>
    %c0_58 = arith.constant 0 : index
    %c0_59 = arith.constant 0 : index
    %85 = vector.load %arg10[%c0_58, %c0_59] : memref<128x128xf32, #tpu.memory_space<vmem>>, vector<128x128xf32>
    %cst_60 = arith.constant dense<0.000000e+00> : vector<32x128xf32>
    %86 = tpu.matmul %84, %85, %cst_60 {dimension_numbers = #tpu.dot_dimension_numbers<[1], [0], [0], [1], [0, 0, 1, 1], [], []>} : vector<32x128xf32>, vector<128x128xf32>, vector<32x128xf32> -> vector<32x128xf32>
    %87 = vector.extract_strided_slice %86 {offsets = [0, 0], sizes = [16, 128], strides = [1, 1]} : vector<32x128xf32> to vector<16x128xf32>
    %88 = vector.extract_strided_slice %86 {offsets = [16, 0], sizes = [16, 128], strides = [1, 1]} : vector<32x128xf32> to vector<16x128xf32>
    %89 = arith.mulf %87, %87 : vector<16x128xf32>
    %90 = arith.subf %88, %89 : vector<16x128xf32>
    %cst_61 = arith.constant 0.000000e+00 : f32
    %91 = vector.broadcast %cst_61 : f32 to vector<16x128xf32>
    %92 = arith.maximumf %90, %91 : vector<16x128xf32>
    %93 = arith.subf %82, %87 : vector<16x128xf32>
    %cst_62 = arith.constant 9.99999993E-9 : f32
    %94 = vector.broadcast %cst_62 : f32 to vector<16x128xf32>
    %95 = arith.addf %92, %94 : vector<16x128xf32>
    %96 = math.rsqrt %95 : vector<16x128xf32>
    %97 = arith.mulf %93, %96 : vector<16x128xf32>
    %c0_63 = arith.constant 0 : index
    %c0_64 = arith.constant 0 : index
    %c0_65 = arith.constant 0 : index
    %98 = vector.load %arg6[%c0_63, %c0_64, %c0_65] : memref<1x32x8xf32, #tpu.memory_space<vmem>>, vector<1x32x8xf32>
    %99 = vector.shape_cast %98 : vector<1x32x8xf32> to vector<32x8xf32>
    %c0_66 = arith.constant 0 : index
    %c0_67 = arith.constant 0 : index
    %100 = vector.load %arg11[%c0_66, %c0_67] : memref<8x128xf32, #tpu.memory_space<vmem>>, vector<8x128xf32>
    %cst_68 = arith.constant dense<0.000000e+00> : vector<32x128xf32>
    %101 = tpu.matmul %99, %100, %cst_68 {dimension_numbers = #tpu.dot_dimension_numbers<[1], [0], [0], [1], [0, 0, 1, 1], [], []>} : vector<32x8xf32>, vector<8x128xf32>, vector<32x128xf32> -> vector<32x128xf32>
    %102 = vector.extract_strided_slice %101 {offsets = [0, 0], sizes = [16, 128], strides = [1, 1]} : vector<32x128xf32> to vector<16x128xf32>
    %103 = arith.mulf %102, %97 : vector<16x128xf32>
    %104 = vector.extract_strided_slice %101 {offsets = [16, 0], sizes = [16, 128], strides = [1, 1]} : vector<32x128xf32> to vector<16x128xf32>
    %105 = arith.addf %103, %104 : vector<16x128xf32>
    %c0_69 = arith.constant 0 : index
    %c0_70 = arith.constant 0 : index
    %c0_71 = arith.constant 0 : index
    %106 = vector.load %arg12[%c0_69, %c0_70, %c0_71] : memref<1x16x128xf32, #tpu.memory_space<vmem>>, vector<1x16x128xf32>
    %107 = vector.shape_cast %106 : vector<1x16x128xf32> to vector<16x128xf32>
    %108 = vector.shape_cast %105 : vector<16x128xf32> to vector<1x16x128xf32>
    tpu.vector_store %arg12[%c0_69, %c0_70, %c0_71], %108 {strides = array<i32>} : memref<1x16x128xf32, #tpu.memory_space<vmem>>, vector<1x16x128xf32>,
    return
  }
  func.func @transform_0(%arg0: i32) -> (i32, i32) {
    %c0_i32 = arith.constant 0 : i32
    %c0_i32_0 = arith.constant 0 : i32
    %c0_i32_1 = arith.constant 0 : i32
    return %c0_i32, %c0_i32_0 : i32, i32
  }
  func.func @transform_1(%arg0: i32) -> (i32, i32, i32) {
    %c0_i32 = arith.constant 0 : i32
    %c0_i32_0 = arith.constant 0 : i32
    %c0_i32_1 = arith.constant 0 : i32
    return %arg0, %c0_i32, %c0_i32_0 : i32, i32, i32
  }
  func.func @transform_2(%arg0: i32) -> (i32, i32) {
    %c0_i32 = arith.constant 0 : i32
    %c0_i32_0 = arith.constant 0 : i32
    %c0_i32_1 = arith.constant 0 : i32
    return %c0_i32, %c0_i32_0 : i32, i32
  }
  func.func @transform_3(%arg0: i32) -> (i32, i32) {
    %c0_i32 = arith.constant 0 : i32
    %c0_i32_0 = arith.constant 0 : i32
    %c0_i32_1 = arith.constant 0 : i32
    return %c0_i32, %c0_i32_0 : i32, i32
  }
  func.func @transform_4(%arg0: i32) -> (i32, i32, i32) {
    %c0_i32 = arith.constant 0 : i32
    %c0_i32_0 = arith.constant 0 : i32
    %c0_i32_1 = arith.constant 0 : i32
    return %arg0, %c0_i32, %c0_i32_0 : i32, i32, i32
  }
  func.func @transform_5(%arg0: i32) -> (i32, i32, i32) {
    %c0_i32 = arith.constant 0 : i32
    %c0_i32_0 = arith.constant 0 : i32
    %c0_i32_1 = arith.constant 0 : i32
    return %arg0, %c0_i32, %c0_i32_0 : i32, i32, i32
  }
  func.func @transform_6(%arg0: i32) -> (i32, i32) {
    %c0_i32 = arith.constant 0 : i32
    %c0_i32_0 = arith.constant 0 : i32
    %c0_i32_1 = arith.constant 0 : i32
    return %c0_i32, %c0_i32_0 : i32, i32
  }
  func.func @transform_7(%arg0: i32) -> (i32, i32) {
    %c0_i32 = arith.constant 0 : i32
    %c0_i32_0 = arith.constant 0 : i32
    %c0_i32_1 = arith.constant 0 : i32
    return %c0_i32, %c0_i32_0 : i32, i32
  }
  func.func @transform_8(%arg0: i32) -> (i32, i32, i32) {
    %c0_i32 = arith.constant 0 : i32
    %c0_i32_0 = arith.constant 0 : i32
    %c0_i32_1 = arith.constant 0 : i32
    %c0_i32_2 = arith.constant 0 : i32
    return %c0_i32, %c0_i32_0, %c0_i32_1 : i32, i32, i32
  }
  func.func @transform_9(%arg0: i32) -> (i32, i32) {
    %c0_i32 = arith.constant 0 : i32
    %c0_i32_0 = arith.constant 0 : i32
    %c0_i32_1 = arith.constant 0 : i32
    return %c0_i32, %c0_i32_0 : i32, i32
  }
  func.func @transform_10(%arg0: i32) -> (i32, i32) {
    %c0_i32 = arith.constant 0 : i32
    %c0_i32_0 = arith.constant 0 : i32
    %c0_i32_1 = arith.constant 0 : i32
    return %c0_i32, %c0_i32_0 : i32, i32
  }
  func.func @transform_11(%arg0: i32) -> (i32, i32, i32) {
    %c0_i32 = arith.constant 0 : i32
    %c0_i32_0 = arith.constant 0 : i32
    %c0_i32_1 = arith.constant 0 : i32
    return %arg0, %c0_i32, %c0_i32_0 : i32, i32, i32
  }
}

module attributes {stable_mosaic.version = 11 : i64} {
  func.func @_synth_kernel(%arg0: i32, %arg1: memref<16x128xf32, #tpu.memory_space<vmem>>, %arg2: memref<1x2x128xf32, #tpu.memory_space<vmem>>, %arg3: memref<16x1xf32, #tpu.memory_space<vmem>>, %arg4: memref<16x1xf32, #tpu.memory_space<vmem>>, %arg5: memref<1x32x8xf32, #tpu.memory_space<vmem>>, %arg6: memref<1x32x8xf32, #tpu.memory_space<vmem>>, %arg7: memref<16x144xbf16, #tpu.memory_space<vmem>>, %arg8: memref<16x1xf32, #tpu.memory_space<vmem>>, %arg9: memref<9x128x128xbf16, #tpu.memory_space<vmem>>, %arg10: memref<128x128xf32, #tpu.memory_space<vmem>>, %arg11: memref<8x128xf32, #tpu.memory_space<vmem>>, %arg12: memref<1x16x128xf32, #tpu.memory_space<vmem>>) attributes {dimension_semantics = [#tpu.dimension_semantics<parallel>], iteration_bounds = array<i64: 1>, scalar_prefetch = 0 : i64, scratch_operands = 0 : i64, tpu.core_type = #tpu.core_type<tc>, window_params = [{pipeline_mode = #tpu.pipeline_mode<synchronous>, transform_indices = @transform_0, window_bounds = array<i64: 16, 128>}, {transform_indices = @transform_1, window_bounds = array<i64: 1, 2, 128>}, {pipeline_mode = #tpu.pipeline_mode<synchronous>, transform_indices = @transform_2, window_bounds = array<i64: 16, 1>}, {pipeline_mode = #tpu.pipeline_mode<synchronous>, transform_indices = @transform_3, window_bounds = array<i64: 16, 1>}, {transform_indices = @transform_4, window_bounds = array<i64: 1, 32, 8>}, {transform_indices = @transform_5, window_bounds = array<i64: 1, 32, 8>}, {pipeline_mode = #tpu.pipeline_mode<synchronous>, transform_indices = @transform_6, window_bounds = array<i64: 16, 144>}, {pipeline_mode = #tpu.pipeline_mode<synchronous>, transform_indices = @transform_7, window_bounds = array<i64: 16, 1>}, {pipeline_mode = #tpu.pipeline_mode<synchronous>, transform_indices = @transform_8, window_bounds = array<i64: 9, 128, 128>}, {pipeline_mode = #tpu.pipeline_mode<synchronous>, transform_indices = @transform_9, window_bounds = array<i64: 128, 128>}, {pipeline_mode = #tpu.pipeline_mode<synchronous>, transform_indices = @transform_10, window_bounds = array<i64: 8, 128>}, {transform_indices = @transform_11, window_bounds = array<i64: 1, 16, 128>}]} {
    %c0 = arith.constant 0 : index
    %c0_0 = arith.constant 0 : index
    %0 = vector.load %arg1[%c0, %c0_0] : memref<16x128xf32, #tpu.memory_space<vmem>>, vector<16x128xf32>
    %c0_1 = arith.constant 0 : index
    %c0_2 = arith.constant 0 : index
    %c0_3 = arith.constant 0 : index
    %1 = vector.load %arg2[%c0_1, %c0_2, %c0_3] : memref<1x2x128xf32, #tpu.memory_space<vmem>>, vector<1x1x128xf32>
    %2 = vector.shape_cast %1 : vector<1x1x128xf32> to vector<1x128xf32>
    %c0_4 = arith.constant 0 : index
    %c0_5 = arith.constant 0 : index
    %3 = vector.load %arg3[%c0_4, %c0_5] : memref<16x1xf32, #tpu.memory_space<vmem>>, vector<16x1xf32>
    %4 = vector.broadcast %2 : vector<1x128xf32> to vector<16x128xf32>
    %5 = vector.broadcast %3 : vector<16x1xf32> to vector<16x128xf32>
    %6 = arith.mulf %4, %5 : vector<16x128xf32>
    %7 = arith.addf %0, %6 : vector<16x128xf32>
    %cst = arith.constant 0.000000e+00 : f32
    %8 = vector.broadcast %cst : f32 to vector<16x128xf32>
    %9 = arith.cmpf oge, %7, %8 : vector<16x128xf32>
    %cst_6 = arith.constant 2.000000e-01 : f32
    %10 = vector.broadcast %cst_6 : f32 to vector<16x128xf32>
    %11 = arith.mulf %10, %7 : vector<16x128xf32>
    %12 = arith.select %9, %7, %11 : vector<16x128xi1>, vector<16x128xf32>
    %13 = arith.mulf %12, %12 : vector<16x128xf32>
    %14 = tpu.concatenate %12, %13 in 0 : vector<16x128xf32>, vector<16x128xf32> -> vector<32x128xf32>
    %c0_7 = arith.constant 0 : index
    %c0_8 = arith.constant 0 : index
    %15 = vector.load %arg10[%c0_7, %c0_8] : memref<128x128xf32, #tpu.memory_space<vmem>>, vector<128x128xf32>
    %cst_9 = arith.constant dense<0.000000e+00> : vector<32x128xf32>
    %16 = tpu.matmul %14, %15, %cst_9 {dimension_numbers = #tpu.dot_dimension_numbers<[1], [0], [0], [1], [0, 0, 1, 1], [], []>} : vector<32x128xf32>, vector<128x128xf32>, vector<32x128xf32> -> vector<32x128xf32>
    %17 = vector.extract_strided_slice %16 {offsets = [0, 0], sizes = [16, 128], strides = [1, 1]} : vector<32x128xf32> to vector<16x128xf32>
    %18 = vector.extract_strided_slice %16 {offsets = [16, 0], sizes = [16, 128], strides = [1, 1]} : vector<32x128xf32> to vector<16x128xf32>
    %19 = arith.mulf %17, %17 : vector<16x128xf32>
    %20 = arith.subf %18, %19 : vector<16x128xf32>
    %cst_10 = arith.constant 0.000000e+00 : f32
    %21 = vector.broadcast %cst_10 : f32 to vector<16x128xf32>
    %22 = arith.maximumf %20, %21 : vector<16x128xf32>
    %23 = arith.subf %12, %17 : vector<16x128xf32>
    %cst_11 = arith.constant 9.99999993E-9 : f32
    %24 = vector.broadcast %cst_11 : f32 to vector<16x128xf32>
    %25 = arith.addf %22, %24 : vector<16x128xf32>
    %26 = math.rsqrt %25 : vector<16x128xf32>
    %27 = arith.mulf %23, %26 : vector<16x128xf32>
    %c0_12 = arith.constant 0 : index
    %c0_13 = arith.constant 0 : index
    %c0_14 = arith.constant 0 : index
    %28 = vector.load %arg5[%c0_12, %c0_13, %c0_14] : memref<1x32x8xf32, #tpu.memory_space<vmem>>, vector<1x32x8xf32>
    %29 = vector.shape_cast %28 : vector<1x32x8xf32> to vector<32x8xf32>
    %c0_15 = arith.constant 0 : index
    %c0_16 = arith.constant 0 : index
    %30 = vector.load %arg11[%c0_15, %c0_16] : memref<8x128xf32, #tpu.memory_space<vmem>>, vector<8x128xf32>
    %cst_17 = arith.constant dense<0.000000e+00> : vector<32x128xf32>
    %31 = tpu.matmul %29, %30, %cst_17 {dimension_numbers = #tpu.dot_dimension_numbers<[1], [0], [0], [1], [0, 0, 1, 1], [], []>} : vector<32x8xf32>, vector<8x128xf32>, vector<32x128xf32> -> vector<32x128xf32>
    %32 = vector.extract_strided_slice %31 {offsets = [0, 0], sizes = [16, 128], strides = [1, 1]} : vector<32x128xf32> to vector<16x128xf32>
    %33 = arith.mulf %32, %27 : vector<16x128xf32>
    %34 = vector.extract_strided_slice %31 {offsets = [16, 0], sizes = [16, 128], strides = [1, 1]} : vector<32x128xf32> to vector<16x128xf32>
    %35 = arith.addf %33, %34 : vector<16x128xf32>
    %36 = arith.truncf %35 : vector<16x128xf32> to vector<16x128xbf16>
    %c0_18 = arith.constant 0 : index
    %c0_19 = arith.constant 0 : index
    %c0_20 = arith.constant 0 : index
    %37 = vector.load %arg9[%c0_18, %c0_19, %c0_20] : memref<9x128x128xbf16, #tpu.memory_space<vmem>>, vector<1x128x128xbf16>
    %38 = vector.shape_cast %37 : vector<1x128x128xbf16> to vector<128x128xbf16>
    %cst_21 = arith.constant dense<0.000000e+00> : vector<16x128xf32>
    %39 = tpu.matmul %36, %38, %cst_21 {dimension_numbers = #tpu.dot_dimension_numbers<[1], [0], [0], [1], [0, 0, 1, 1], [], []>} : vector<16x128xbf16>, vector<128x128xbf16>, vector<16x128xf32> -> vector<16x128xf32>
    %c1 = arith.constant 1 : index
    %c0_22 = arith.constant 0 : index
    %c0_23 = arith.constant 0 : index
    %40 = vector.load %arg9[%c1, %c0_22, %c0_23] : memref<9x128x128xbf16, #tpu.memory_space<vmem>>, vector<1x128x128xbf16>
    %41 = vector.shape_cast %40 : vector<1x128x128xbf16> to vector<128x128xbf16>
    %cst_24 = arith.constant dense<0.000000e+00> : vector<16x128xf32>
    %42 = tpu.matmul %36, %41, %cst_24 {dimension_numbers = #tpu.dot_dimension_numbers<[1], [0], [0], [1], [0, 0, 1, 1], [], []>} : vector<16x128xbf16>, vector<128x128xbf16>, vector<16x128xf32> -> vector<16x128xf32>
    %c2 = arith.constant 2 : index
    %c0_25 = arith.constant 0 : index
    %c0_26 = arith.constant 0 : index
    %43 = vector.load %arg9[%c2, %c0_25, %c0_26] : memref<9x128x128xbf16, #tpu.memory_space<vmem>>, vector<1x128x128xbf16>
    %44 = vector.shape_cast %43 : vector<1x128x128xbf16> to vector<128x128xbf16>
    %cst_27 = arith.constant dense<0.000000e+00> : vector<16x128xf32>
    %45 = tpu.matmul %36, %44, %cst_27 {dimension_numbers = #tpu.dot_dimension_numbers<[1], [0], [0], [1], [0, 0, 1, 1], [], []>} : vector<16x128xbf16>, vector<128x128xbf16>, vector<16x128xf32> -> vector<16x128xf32>
    %c3 = arith.constant 3 : index
    %c0_28 = arith.constant 0 : index
    %c0_29 = arith.constant 0 : index
    %46 = vector.load %arg9[%c3, %c0_28, %c0_29] : memref<9x128x128xbf16, #tpu.memory_space<vmem>>, vector<1x128x128xbf16>
    %47 = vector.shape_cast %46 : vector<1x128x128xbf16> to vector<128x128xbf16>
    %cst_30 = arith.constant dense<0.000000e+00> : vector<16x128xf32>
    %48 = tpu.matmul %36, %47, %cst_30 {dimension_numbers = #tpu.dot_dimension_numbers<[1], [0], [0], [1], [0, 0, 1, 1], [], []>} : vector<16x128xbf16>, vector<128x128xbf16>, vector<16x128xf32> -> vector<16x128xf32>
    %c4 = arith.constant 4 : index
    %c0_31 = arith.constant 0 : index
    %c0_32 = arith.constant 0 : index
    %49 = vector.load %arg9[%c4, %c0_31, %c0_32] : memref<9x128x128xbf16, #tpu.memory_space<vmem>>, vector<1x128x128xbf16>
    %50 = vector.shape_cast %49 : vector<1x128x128xbf16> to vector<128x128xbf16>
    %cst_33 = arith.constant dense<0.000000e+00> : vector<16x128xf32>
    %51 = tpu.matmul %36, %50, %cst_33 {dimension_numbers = #tpu.dot_dimension_numbers<[1], [0], [0], [1], [0, 0, 1, 1], [], []>} : vector<16x128xbf16>, vector<128x128xbf16>, vector<16x128xf32> -> vector<16x128xf32>
    %c5 = arith.constant 5 : index
    %c0_34 = arith.constant 0 : index
    %c0_35 = arith.constant 0 : index
    %52 = vector.load %arg9[%c5, %c0_34, %c0_35] : memref<9x128x128xbf16, #tpu.memory_space<vmem>>, vector<1x128x128xbf16>
    %53 = vector.shape_cast %52 : vector<1x128x128xbf16> to vector<128x128xbf16>
    %cst_36 = arith.constant dense<0.000000e+00> : vector<16x128xf32>
    %54 = tpu.matmul %36, %53, %cst_36 {dimension_numbers = #tpu.dot_dimension_numbers<[1], [0], [0], [1], [0, 0, 1, 1], [], []>} : vector<16x128xbf16>, vector<128x128xbf16>, vector<16x128xf32> -> vector<16x128xf32>
    %c6 = arith.constant 6 : index
    %c0_37 = arith.constant 0 : index
    %c0_38 = arith.constant 0 : index
    %55 = vector.load %arg9[%c6, %c0_37, %c0_38] : memref<9x128x128xbf16, #tpu.memory_space<vmem>>, vector<1x128x128xbf16>
    %56 = vector.shape_cast %55 : vector<1x128x128xbf16> to vector<128x128xbf16>
    %cst_39 = arith.constant dense<0.000000e+00> : vector<16x128xf32>
    %57 = tpu.matmul %36, %56, %cst_39 {dimension_numbers = #tpu.dot_dimension_numbers<[1], [0], [0], [1], [0, 0, 1, 1], [], []>} : vector<16x128xbf16>, vector<128x128xbf16>, vector<16x128xf32> -> vector<16x128xf32>
    %c7 = arith.constant 7 : index
    %c0_40 = arith.constant 0 : index
    %c0_41 = arith.constant 0 : index
    %58 = vector.load %arg9[%c7, %c0_40, %c0_41] : memref<9x128x128xbf16, #tpu.memory_space<vmem>>, vector<1x128x128xbf16>
    %59 = vector.shape_cast %58 : vector<1x128x128xbf16> to vector<128x128xbf16>
    %cst_42 = arith.constant dense<0.000000e+00> : vector<16x128xf32>
    %60 = tpu.matmul %36, %59, %cst_42 {dimension_numbers = #tpu.dot_dimension_numbers<[1], [0], [0], [1], [0, 0, 1, 1], [], []>} : vector<16x128xbf16>, vector<128x128xbf16>, vector<16x128xf32> -> vector<16x128xf32>
    %c8 = arith.constant 8 : index
    %c0_43 = arith.constant 0 : index
    %c0_44 = arith.constant 0 : index
    %61 = vector.load %arg9[%c8, %c0_43, %c0_44] : memref<9x128x128xbf16, #tpu.memory_space<vmem>>, vector<1x128x128xbf16>
    %62 = vector.shape_cast %61 : vector<1x128x128xbf16> to vector<128x128xbf16>
    %cst_45 = arith.constant dense<0.000000e+00> : vector<16x128xf32>
    %63 = tpu.matmul %36, %62, %cst_45 {dimension_numbers = #tpu.dot_dimension_numbers<[1], [0], [0], [1], [0, 0, 1, 1], [], []>} : vector<16x128xbf16>, vector<128x128xbf16>, vector<16x128xf32> -> vector<16x128xf32>
    %64 = tpu.concatenate %39, %42, %45, %48, %51, %54, %57, %60, %63 in 0 : vector<16x128xf32>, vector<16x128xf32>, vector<16x128xf32>, vector<16x128xf32>, vector<16x128xf32>, vector<16x128xf32>, vector<16x128xf32>, vector<16x128xf32>, vector<16x128xf32> -> vector<144x128xf32>
    %65 = arith.truncf %64 : vector<144x128xf32> to vector<144x128xbf16>
    %c0_46 = arith.constant 0 : index
    %c0_47 = arith.constant 0 : index
    %66 = vector.load %arg7[%c0_46, %c0_47] : memref<16x144xbf16, #tpu.memory_space<vmem>>, vector<16x144xbf16>
    %cst_48 = arith.constant dense<0.000000e+00> : vector<16x128xf32>
    %67 = tpu.matmul %66, %65, %cst_48 {dimension_numbers = #tpu.dot_dimension_numbers<[1], [0], [0], [1], [0, 0, 1, 1], [], []>} : vector<16x144xbf16>, vector<144x128xbf16>, vector<16x128xf32> -> vector<16x128xf32>
    %c0_49 = arith.constant 0 : index
    %c0_50 = arith.constant 0 : index
    %68 = vector.load %arg8[%c0_49, %c0_50] : memref<16x1xf32, #tpu.memory_space<vmem>>, vector<16x1xf32>
    %69 = vector.broadcast %68 : vector<16x1xf32> to vector<16x128xf32>
    %70 = arith.addf %67, %69 : vector<16x128xf32>
    %c0_51 = arith.constant 0 : index
    %c1_52 = arith.constant 1 : index
    %c0_53 = arith.constant 0 : index
    %71 = vector.load %arg2[%c0_51, %c1_52, %c0_53] : memref<1x2x128xf32, #tpu.memory_space<vmem>>, vector<1x1x128xf32>
    %72 = vector.shape_cast %71 : vector<1x1x128xf32> to vector<1x128xf32>
    %c0_54 = arith.constant 0 : index
    %c0_55 = arith.constant 0 : index
    %73 = vector.load %arg4[%c0_54, %c0_55] : memref<16x1xf32, #tpu.memory_space<vmem>>, vector<16x1xf32>
    %74 = vector.broadcast %72 : vector<1x128xf32> to vector<16x128xf32>
    %75 = vector.broadcast %73 : vector<16x1xf32> to vector<16x128xf32>
    %76 = arith.mulf %74, %75 : vector<16x128xf32>
    %77 = arith.addf %70, %76 : vector<16x128xf32>
    %cst_56 = arith.constant 0.000000e+00 : f32
    %78 = vector.broadcast %cst_56 : f32 to vector<16x128xf32>
    %79 = arith.cmpf oge, %77, %78 : vector<16x128xf32>
    %cst_57 = arith.constant 2.000000e-01 : f32
    %80 = vector.broadcast %cst_57 : f32 to vector<16x128xf32>
    %81 = arith.mulf %80, %77 : vector<16x128xf32>
    %82 = arith.select %79, %77, %81 : vector<16x128xi1>, vector<16x128xf32>
    %83 = arith.mulf %82, %82 : vector<16x128xf32>
    %84 = tpu.concatenate %82, %83 in 0 : vector<16x128xf32>, vector<16x128xf32> -> vector<32x128xf32>
    %c0_58 = arith.constant 0 : index
    %c0_59 = arith.constant 0 : index
    %85 = vector.load %arg10[%c0_58, %c0_59] : memref<128x128xf32, #tpu.memory_space<vmem>>, vector<128x128xf32>
    %cst_60 = arith.constant dense<0.000000e+00> : vector<32x128xf32>
    %86 = tpu.matmul %84, %85, %cst_60 {dimension_numbers = #tpu.dot_dimension_numbers<[1], [0], [0], [1], [0, 0, 1, 1], [], []>} : vector<32x128xf32>, vector<128x128xf32>, vector<32x128xf32> -> vector<32x128xf32>
    %87 = vector.extract_strided_slice %86 {offsets = [0, 0], sizes = [16, 128], strides = [1, 1]} : vector<32x128xf32> to vector<16x128xf32>
    %88 = vector.extract_strided_slice %86 {offsets = [16, 0], sizes = [16, 128], strides = [1, 1]} : vector<32x128xf32> to vector<16x128xf32>
    %89 = arith.mulf %87, %87 : vector<16x128xf32>
    %90 = arith.subf %88, %89 : vector<16x128xf32>
    %cst_61 = arith.constant 0.000000e+00 : f32
    %91 = vector.broadcast %cst_61 : f32 to vector<16x128xf32>
    %92 = arith.maximumf %90, %91 : vector<16x128xf32>
    %93 = arith.subf %82, %87 : vector<16x128xf32>
    %cst_62 = arith.constant 9.99999993E-9 : f32
    %94 = vector.broadcast %cst_62 : f32 to vector<16x128xf32>
    %95 = arith.addf %92, %94 : vector<16x128xf32>
    %96 = math.rsqrt %95 : vector<16x128xf32>
    %97 = arith.mulf %93, %96 : vector<16x128xf32>
    %c0_63 = arith.constant 0 : index
    %c0_64 = arith.constant 0 : index
    %c0_65 = arith.constant 0 : index
    %98 = vector.load %arg6[%c0_63, %c0_64, %c0_65] : memref<1x32x8xf32, #tpu.memory_space<vmem>>, vector<1x32x8xf32>
    %99 = vector.shape_cast %98 : vector<1x32x8xf32> to vector<32x8xf32>
    %c0_66 = arith.constant 0 : index
    %c0_67 = arith.constant 0 : index
    %100 = vector.load %arg11[%c0_66, %c0_67] : memref<8x128xf32, #tpu.memory_space<vmem>>, vector<8x128xf32>
    %cst_68 = arith.constant dense<0.000000e+00> : vector<32x128xf32>
    %101 = tpu.matmul %99, %100, %cst_68 {dimension_numbers = #tpu.dot_dimension_numbers<[1], [0], [0], [1], [0, 0, 1, 1], [], []>} : vector<32x8xf32>, vector<8x128xf32>, vector<32x128xf32> -> vector<32x128xf32>
    %102 = vector.extract_strided_slice %101 {offsets = [0, 0], sizes = [16, 128], strides = [1, 1]} : vector<32x128xf32> to vector<16x128xf32>
    %103 = arith.mulf %102, %97 : vector<16x128xf32>
    %104 = vector.extract_strided_slice %101 {offsets = [16, 0], sizes = [16, 128], strides = [1, 1]} : vector<32x128xf32> to vector<16x128xf32>
    %105 = arith.addf %103, %104 : vector<16x128xf32>
    %c0_69 = arith.constant 0 : index
    %c0_70 = arith.constant 0 : index
    %c0_71 = arith.constant 0 : index
    %106 = vector.load %arg12[%c0_69, %c0_70, %c0_71] : memref<1x16x128xf32, #tpu.memory_space<vmem>>, vector<1x16x128xf32>
    %107 = vector.shape_cast %106 : vector<1x16x128xf32> to vector<16x128xf32>
    %108 = vector.shape_cast %105 : vector<16x128xf32> to vector<1x16x128xf32>
    tpu.vector_store %arg12[%c0_69, %c0_70, %c0_71], %108 {strides = array<i32>} : memref<1x16x128xf32, #tpu.memory_space<vmem>>, vector<1x16x128xf32>,
    return
  }
  func.func @transform_0(%arg0: i32) -> (i32, i32) {
    %c0_i32 = arith.constant 0 : i32
    %c0_i32_0 = arith.constant 0 : i32
    %c0_i32_1 = arith.constant 0 : i32
    return %c0_i32, %c0_i32_0 : i32, i32
  }
  func.func @transform_1(%arg0: i32) -> (i32, i32, i32) {
    %c0_i32 = arith.constant 0 : i32
    %c0_i32_0 = arith.constant 0 : i32
    %c0_i32_1 = arith.constant 0 : i32
    return %arg0, %c0_i32, %c0_i32_0 : i32, i32, i32
  }
  func.func @transform_2(%arg0: i32) -> (i32, i32) {
    %c0_i32 = arith.constant 0 : i32
    %c0_i32_0 = arith.constant 0 : i32
    %c0_i32_1 = arith.constant 0 : i32
    return %c0_i32, %c0_i32_0 : i32, i32
  }
  func.func @transform_3(%arg0: i32) -> (i32, i32) {
    %c0_i32 = arith.constant 0 : i32
    %c0_i32_0 = arith.constant 0 : i32
    %c0_i32_1 = arith.constant 0 : i32
    return %c0_i32, %c0_i32_0 : i32, i32
  }
  func.func @transform_4(%arg0: i32) -> (i32, i32, i32) {
    %c0_i32 = arith.constant 0 : i32
    %c0_i32_0 = arith.constant 0 : i32
    %c0_i32_1 = arith.constant 0 : i32
    return %arg0, %c0_i32, %c0_i32_0 : i32, i32, i32
  }
  func.func @transform_5(%arg0: i32) -> (i32, i32, i32) {
    %c0_i32 = arith.constant 0 : i32
    %c0_i32_0 = arith.constant 0 : i32
    %c0_i32_1 = arith.constant 0 : i32
    return %arg0, %c0_i32, %c0_i32_0 : i32, i32, i32
  }
  func.func @transform_6(%arg0: i32) -> (i32, i32) {
    %c0_i32 = arith.constant 0 : i32
    %c0_i32_0 = arith.constant 0 : i32
    %c0_i32_1 = arith.constant 0 : i32
    return %c0_i32, %c0_i32_0 : i32, i32
  }
  func.func @transform_7(%arg0: i32) -> (i32, i32) {
    %c0_i32 = arith.constant 0 : i32
    %c0_i32_0 = arith.constant 0 : i32
    %c0_i32_1 = arith.constant 0 : i32
    return %c0_i32, %c0_i32_0 : i32, i32
  }
  func.func @transform_8(%arg0: i32) -> (i32, i32, i32) {
    %c0_i32 = arith.constant 0 : i32
    %c0_i32_0 = arith.constant 0 : i32
    %c0_i32_1 = arith.constant 0 : i32
    %c0_i32_2 = arith.constant 0 : i32
    return %c0_i32, %c0_i32_0, %c0_i32_1 : i32, i32, i32
  }
  func.func @transform_9(%arg0: i32) -> (i32, i32) {
    %c0_i32 = arith.constant 0 : i32
    %c0_i32_0 = arith.constant 0 : i32
    %c0_i32_1 = arith.constant 0 : i32
    return %c0_i32, %c0_i32_0 : i32, i32
  }
  func.func @transform_10(%arg0: i32) -> (i32, i32) {
    %c0_i32 = arith.constant 0 : i32
    %c0_i32_0 = arith.constant 0 : i32
    %c0_i32_1 = arith.constant 0 : i32
    return %c0_i32, %c0_i32_0 : i32, i32
  }
  func.func @transform_11(%arg0: i32) -> (i32, i32, i32) {
    %c0_i32 = arith.constant 0 : i32
    %c0_i32_0 = arith.constant 0 : i32
    %c0_i32_1 = arith.constant 0 : i32
    return %arg0, %c0_i32, %c0_i32_0 : i32, i32, i32
  }
}

</mosaic_0001>

<bundles_post_ra>
// kernel: tpu_custom_call.1
= control target key start
LH: loop header
LB: loop body
LE: loop exit
PB: predicated region body
PF: predicated region fallthrough
CT: control target
= control target key end

     0   :  { %16 = vsyncpa [#allocation3], 0  ;;  %s1894_s0 = inlined_call_operand.vmem [shape: f32[16,128], index: 0, kind: input, shape index: {}]   ;;  %s1895_s1 = inlined_call_operand.vmem [shape: f32[1,2,128], index: 1, kind: input, shape index: {}]   ;;  %s1896_s2 = inlined_call_operand.vmem [shape: f32[16,1], index: 2, kind: input, shape index: {}]   ;;  %s1897_s3 = inlined_call_operand.vmem [shape: f32[16,1], index: 3, kind: input, shape index: {}]   ;;  %s1898_s4 = inlined_call_operand.vmem [shape: f32[1,32,8], index: 4, kind: input, shape index: {}]   ;;  %s1899_s5 = inlined_call_operand.vmem [shape: f32[1,32,8], index: 5, kind: input, shape index: {}]   ;;  %s1900_s6 = inlined_call_operand.vmem [shape: bf16[16,144], index: 6, kind: input, shape index: {}]   ;;  %s1901_s7 = inlined_call_operand.vmem [shape: f32[16,1], index: 7, kind: input, shape index: {}]   ;;  %s1902_s8 = inlined_call_operand.hbm [shape: bf16[9,128,128], index: 8, kind: input, shape index: {}]   ;;  %s1903_s9 = inlined_call_operand.hbm [shape: f32[128,128], index: 9, kind: input, shape index: {}]   ;;  %s1904_s10 = inlined_call_operand.vmem [shape: f32[8,128], index: 10, kind: input, shape index: {}]   ;;  %s1905_s11 = inlined_call_operand.hbm [shape: f32[1,16,128], index: 11, kind: output, shape index: {}]  }
   0x1   :  { %17 = vsyncpa [#allocation6], 0 }
   0x2   :  { %18 = vsyncpa [#allocation4], 0  ;;  %s39_s19 = sshll.u32 %s1902_s8, 4  ;;  %s1640_s20 = smov [#allocation2]   ;;  %s40_s19 = int_to_ptr.hbm [resolvable:$true] %s39_s19 }
   0x3   :  { %s41_s21 = sshll.u32 %s1640_s20, 4  ;;  %s52_s24 = sshll.u32 %s1903_s9, 4  ;;  %s42_s21 = int_to_ptr.vmem [resolvable:$true] %s41_s21  ;;  %s53_s24 = int_to_ptr.hbm [resolvable:$true] %s52_s24 }
   0x4   :  { %s1641_s25 = smov 64   ;;  %s1642_s26 = smov 4  }
   0x5   :  { %47 = dma.hbm_to_vmem [thread:$0]  %s40_s19, 9216, %s42_s21, [#allocation3], %s1641_s25, %s1641_s25, %s1642_s26  }
   0x6   :  { %s1643_s27 = smov [#allocation5]   ;;  %s1644_s29 = smov 128  }
   0x7   :  { %s54_s28 = sshll.u32 %s1643_s27, 4  ;;  %s1645_s30 = smov 8   ;;  %s55_s28 = int_to_ptr.vmem [resolvable:$true] %s54_s28 }
   0x8   :  { %60 = dma.hbm_to_vmem [thread:$0]  %s53_s24, 2048, %s55_s28, [#allocation6], %s1644_s29, %s1644_s29, %s1645_s30  }
   0x9   :  { %1634 = dma.done.wait [#allocation3], 9216  }
   0xa   :  { %1635 = vsyncadd [#allocation3], 4294958080 }
   0xb   :  { %1636 = dma.done.wait [#allocation6], 2048  }
   0xc   :  { %1637 = vsyncadd [#allocation6], 4294965248  ;;  %v1646_v0 = vmov 0   ;;  %v75_v1 = vld [vmem:[%s1896_s2] sm:$0xff]  ;;  %v1720_v2 = vld [vmem:[#allocation5 + $0x78] sm:$0xff]  ;;  %vm182_vm0 = vcmask 64512  }
   0xd   :  { %1549 = vset.pattern.permute.xlu0 %v1646_v0  ;;  %1550 = vset.pattern.permute.xlu1 %v1646_v0  ;;  %v1723_v3 = vld [vmem:[#allocation5 + $0x70] sm:$0xff]  ;;  %v1725_v4 = vld [vmem:[#allocation5 + $0x68] sm:$0xff]  ;;  %v1728_v5 = vld [vmem:[#allocation5 + $0x60] sm:$0xff]  ;;  %vm971_vm9 = vcmask 130048   ;;  %s1147_s28 = sshll.u32 %s1905_s11, 4  ;;  %s1148_s28 = int_to_ptr.hbm [resolvable:$true] %s1147_s28 }
   0xe   :  { %1551 = vset.pattern.permute.xlu2 %v1646_v0  ;;  %80 = vperm.xlu0 %1549, %v75_v1   ;;  %v76_v6 = vld [vmem:[%s1896_s2 + $0x8] sm:$0xff]  ;;  %v1734_v7 = vld [vmem:[#allocation5 + $0x58] sm:$0xff]  ;;  %v1737_v8 = vld [vmem:[#allocation5 + $0x50] sm:$0xff] }
   0xf   :  { %116 = vmatpush.msra.mxu0 %v1720_v2  ;;  %v1740_v9 = vld [vmem:[#allocation5 + $0x48] sm:$0xff]  ;;  %v1743_v10 = vld [vmem:[#allocation5 + $0x40] sm:$0xff]  ;;  %v1746_v11 = vld [vmem:[#allocation5 + $0x38] sm:$0xff] }
  0x10   :  { %v1749_v12 = vld [vmem:[#allocation5 + $0x30] sm:$0xff]  ;;  %v1752_v13 = vld [vmem:[#allocation5 + $0x28] sm:$0xff]  ;;  %v1755_v14 = vld [vmem:[#allocation5 + $0x20] sm:$0xff] }
  0x11   :  { %117 = vmatpush.msra.mxu0 %v1723_v3  ;;  %v1759_v15 = vld [vmem:[#allocation5 + $0x18] sm:$0xff]  ;;  %v1762_v16 = vld [vmem:[#allocation5 + $0x10] sm:$0xff]  ;;  %v1765_v17 = vld [vmem:[#allocation5 + $0x8] sm:$0xff] }
  0x12   :  { %v1767_v18 = vld [vmem:[#allocation5] sm:$0xff]  ;;  %v178_v28 = vld [vmem:[%s1898_s4 + $0x8] sm:$0xff]  ;;  %v179_v35 = vld [vmem:[%s1898_s4 + $0x10] sm:$0xff] }
  0x13   :  { %118 = vmatpush.msra.mxu0 %v1725_v4  ;;  %v1552_v19 = vld [vmem:[%s1895_s1] ss:$0 sm:$0xff]  ;;  %v73_v30 = vld [vmem:[%s1894_s0 + $0x8] sm:$0xff]  ;;  %v180_v37 = vld [vmem:[%s1898_s4 + $0x18] sm:$0xff] }
  0x14   :  { %v72_v21 = vld [vmem:[%s1894_s0] sm:$0xff]  ;;  %v1473_v39 = vld [vmem:[#allocation2 + $0x38] sm:$0xff]  ;;  %v1472_v40 = vld [vmem:[#allocation2 + $0x30] sm:$0xff] }
  0x15   :  { %119 = vmatpush.msra.mxu0 %v1728_v5  ;;  %v1780_v22 = vld [vmem:[%s1904_s10] sm:$0xff]  ;;  %293 = vmatpush.bf16.msra.mxu2 %v1473_v39  ;;  %v1471_v41 = vld [vmem:[#allocation2 + $0x28] sm:$0xff]  ;;  %v1481_v43 = vld [vmem:[#allocation2 + $0x78] sm:$0xff] }
  0x16   :  { %85 = vperm.xlu0 %1549, %v76_v6   ;;  %v177_v23 = vld [vmem:[%s1898_s4] sm:$0xff]  ;;  %210 = vmatpush.msra.mxu1 %v1780_v22  ;;  %v1489_v44 = vld [vmem:[#allocation2 + $0xb8] sm:$0xff]  ;;  %v1480_v47 = vld [vmem:[#allocation2 + $0x70] sm:$0xff] }
  0x17   :  { %120 = vmatpush.msra.mxu0 %v1734_v7  ;;  %1161 = vmatmul.msk.f32.vlgmr.msra.gmra.mxu1 %vm182_vm0, %v177_v23  ;;  %v1470_v42 = vld [vmem:[#allocation2 + $0x20] sm:$0xff]  ;;  %v1497_v45 = vld [vmem:[#allocation2 + $0xf8] sm:$0xff]  ;;  %v1488_v48 = vld [vmem:[#allocation2 + $0xb0] sm:$0xff] }
  0x18   :  { %372 = vmatpush.bf16.msra.mxu3 %v1481_v43  ;;  %451 = vmatpush.bf16.msrb.mxu1 %v1489_v44  ;;  %v1469_v46 = vld [vmem:[#allocation2 + $0x18] sm:$0xff]  ;;  %v1496_v49 = vld [vmem:[#allocation2 + $0xf0] sm:$0xff]  ;;  %v1479_v51 = vld [vmem:[#allocation2 + $0x68] sm:$0xff] }
  0x19   :  { %121 = vmatpush.msra.mxu0 %v1737_v8  ;;  %294 = vmatpush.bf16.msra.mxu2 %v1472_v40  ;;  %v1468_v50 = vld [vmem:[#allocation2 + $0x10] sm:$0xff]  ;;  %v1487_v52 = vld [vmem:[#allocation2 + $0xa8] sm:$0xff]  ;;  %v1478_v55 = vld [vmem:[#allocation2 + $0x60] sm:$0xff] }
  0x1a   :  { %v1495_v53 = vld [vmem:[#allocation2 + $0xe8] sm:$0xff]  ;;  %v1486_v56 = vld [vmem:[#allocation2 + $0xa0] sm:$0xff]  ;;  %v1477_v59 = vld [vmem:[#allocation2 + $0x58] sm:$0xff] }
  0x1b   :  { %122 = vmatpush.msra.mxu0 %v1740_v9  ;;  %v1467_v54 = vld [vmem:[#allocation2 + $0x8] sm:$0xff]  ;;  %v1494_v57 = vld [vmem:[#allocation2 + $0xe0] sm:$0xff]  ;;  %v1485_v60 = vld [vmem:[#allocation2 + $0x98] sm:$0xff] }
  0x1c   :  { %373 = vmatpush.bf16.msra.mxu3 %v1480_v47  ;;  %452 = vmatpush.bf16.msrb.mxu1 %v1488_v48  ;;  %v1466_v58 = vld [vmem:[#allocation2] sm:$0xff]  ;;  %v1493_v61 = vld [vmem:[#allocation2 + $0xd8] sm:$0xff]  ;;  %v1476_v63 = vld [vmem:[#allocation2 + $0x50] sm:$0xff] }
  0x1d   :  { %123 = vmatpush.msra.mxu0 %v1743_v10  ;;  %295 = vmatpush.bf16.msra.mxu2 %v1471_v41  ;;  %v1505_v62 = vld [vmem:[#allocation2 + $0x138] sm:$0xff]  ;;  %v1484_v0 = vld [vmem:[#allocation2 + $0x90] sm:$0xff]  ;;  %v1491_v23 = vld [vmem:[#allocation2 + $0xc8] sm:$0xff] }
  0x1e   :  { %v1492_v1 = vld [vmem:[#allocation2 + $0xd0] sm:$0xff]  ;;  %v1519_v43 = vld [vmem:[#allocation2 + $0x1a8] sm:$0xff] }
  0x1f   :  { %124 = vmatpush.msra.mxu0 %v1746_v11  ;;  %1162 = vmatmul.msk.f32.gmra.mxu1 %vm182_vm0, %v178_v28  ;;  %v1490_v28 = vld [vmem:[#allocation2 + $0xc0] sm:$0xff]  ;;  %v1500_v40 = vld [vmem:[#allocation2 + $0x110] sm:$0xff]  ;;  %v1527_v44 = vld [vmem:[#allocation2 + $0x1e8] sm:$0xff] }
  0x20   :  { %374 = vmatpush.bf16.msra.mxu3 %v1479_v51  ;;  %453 = vmatpush.bf16.msrb.mxu1 %v1487_v52  ;;  %v1499_v47 = vld [vmem:[#allocation2 + $0x108] sm:$0xff]  ;;  %v1526_v51 = vld [vmem:[#allocation2 + $0x1e0] sm:$0xff] }
  0x21   :  { %125 = vmatpush.msra.mxu0 %v1749_v12  ;;  %296 = vmatpush.bf16.msra.mxu2 %v1470_v42  ;;  %v1511_v42 = vld [vmem:[#allocation2 + $0x168] sm:$0xff] }
  0x23   :  { %126 = vmatpush.msra.mxu0 %v1752_v13 }
  0x24   :  { %375 = vmatpush.bf16.msra.mxu3 %v1478_v55  ;;  %454 = vmatpush.bf16.msrb.mxu1 %v1486_v56  ;;  %v1498_v55 = vld [vmem:[#allocation2 + $0x100] sm:$0xff] }
  0x25   :  { %127 = vmatpush.msra.mxu0 %v1755_v14  ;;  %297 = vmatpush.bf16.msra.mxu2 %v1469_v46 }
  0x27   :  { %128 = vmatpush.msra.mxu0 %v1759_v15  ;;  %1163 = vmatmul.msk.f32.gmra.mxu1 %vm182_vm0, %v179_v35  ;;  %v1501_v35 = vld [vmem:[#allocation2 + $0x118] sm:$0xff] }
  0x28   :  { %376 = vmatpush.bf16.msra.mxu3 %v1477_v59  ;;  %455 = vmatpush.bf16.msrb.mxu1 %v1485_v60  ;;  %v1525_v59 = vld [vmem:[#allocation2 + $0x1d8] sm:$0xff] }
  0x29   :  { %129 = vmatpush.msra.mxu0 %v1762_v16  ;;  %298 = vmatpush.bf16.msra.mxu2 %v1468_v50  ;;  %v1518_v50 = vld [vmem:[#allocation2 + $0x1a0] sm:$0xff] }
  0x2b   :  { %130 = vmatpush.msra.mxu0 %v1765_v17 }
  0x2c   :  { %377 = vmatpush.bf16.msra.mxu3 %v1476_v63  ;;  %456 = vmatpush.bf16.msrb.mxu1 %v1484_v0  ;;  %v1524_v63 = vld [vmem:[#allocation2 + $0x1d0] sm:$0xff] }
  0x2d   :  { %131 = vmatpush.msra.mxu0 %v1767_v18  ;;  %299 = vmatpush.bf16.msra.mxu2 %v1467_v54 }
  0x2f   :  { %1164 = vmatmul.msk.f32.gmra.mxu1 %vm182_vm0, %v180_v37  ;;  %530 = vmatpush.bf16.msrb.mxu0 %v1497_v45  ;;  %v1520_v37 = vld [vmem:[#allocation2 + $0x1b0] sm:$0xff] }
  0x31   :  { %300 = vmatpush.bf16.msra.mxu2 %v1466_v58  ;;  %v1517_v58 = vld [vmem:[#allocation2 + $0x198] sm:$0xff] }
  0x33   :  { %531 = vmatpush.bf16.msrb.mxu0 %v1496_v49  ;;  %v1510_v49 = vld [vmem:[#allocation2 + $0x160] sm:$0xff] }
  0x35   :  { %609 = vmatpush.bf16.msrb.mxu2 %v1505_v62  ;;  %v1516_v62 = vld [vmem:[#allocation2 + $0x190] sm:$0xff] }
  0x37   :  { %532 = vmatpush.bf16.msrb.mxu0 %v1495_v53 }
  0x3b   :  { %533 = vmatpush.bf16.msrb.mxu0 %v1494_v57  ;;  %v1509_v57 = vld [vmem:[#allocation2 + $0x158] sm:$0xff] }
  0x3f   :  { %534 = vmatpush.bf16.msrb.mxu0 %v1493_v61  ;;  %v1508_v61 = vld [vmem:[#allocation2 + $0x150] sm:$0xff] }
  0x43   :  { %535 = vmatpush.bf16.msrb.mxu0 %v1492_v1 }
  0x47   :  { %536 = vmatpush.bf16.msrb.mxu0 %v1491_v23  ;;  %v1515_v23 = vld [vmem:[#allocation2 + $0x188] sm:$0xff] }
  0x4b   :  { %537 = vmatpush.bf16.msrb.mxu0 %v1490_v28  ;;  %v1506_v28 = vld [vmem:[#allocation2 + $0x140] sm:$0xff] }
  0x80   :  { %v81_v20 = vpop.permute.xlu0 %80 }
  0x81   :  { %v88_v24 = vmul.f32 %v1552_v19, %v81_v20  ;;  %v1475_v20 = vld [vmem:[#allocation2 + $0x48] sm:$0xff] }
  0x82   :  { %378 = vmatpush.bf16.msra.mxu3 %v1475_v20 }
  0x83   :  { %v90_v25 = vadd.f32 %v88_v24, %v72_v21  ;;  %v1483_v21 = vld [vmem:[#allocation2 + $0x88] sm:$0xff] }
  0x84   :  { %v1503_v24 = vld [vmem:[#allocation2 + $0x128] sm:$0xff]  ;;  %457 = vmatpush.bf16.msrb.mxu1 %v1483_v21 }
  0x85   :  { %vm92_vm1 = vcmp.ge.f32.partialorder %v90_v25, 0.0  ;;  %v94_v26 = vmul.f32 0.2, %v90_v25  ;;  %v1507_v21 = vld [vmem:[#allocation2 + $0x148] sm:$0xff] }
  0x87   :  { %v1787_v27 = vsel %vm92_vm1, %v90_v25, %v94_v26  ;;  %v1474_v25 = vld [vmem:[#allocation2 + $0x40] sm:$0xff] }
  0x88   :  { %v86_v29 = vpop.permute.xlu0 %85  ;;  %132 = vmatmul.f32.vlgmr.msra.gmra.mxu0 %v1787_v27  ;;  %v98_v36 = vmul.f32 %v1787_v27, %v1787_v27  ;;  %v1482_v26 = vld [vmem:[#allocation2 + $0x80] sm:$0xff]  ;;  %379 = vmatpush.bf16.msra.mxu3 %v1474_v25  ;;  %v1523_v25 = vld [vmem:[#allocation2 + $0x1c8] sm:$0xff] }
  0x89   :  { %v89_v31 = vmul.f32 %v1552_v19, %v86_v29  ;;  %v1504_v19 = vld [vmem:[#allocation2 + $0x130] sm:$0xff]  ;;  %458 = vmatpush.bf16.msrb.mxu1 %v1482_v26 }
  0x8a   :  { %610 = vmatpush.bf16.msrb.mxu2 %v1504_v19 }
  0x8b   :  { %v91_v32 = vadd.f32 %v89_v31, %v73_v30  ;;  %v1502_v30 = vld [vmem:[#allocation2 + $0x120] sm:$0xff]  ;;  %v1513_v31 = vld [vmem:[#allocation2 + $0x178] sm:$0xff] }
  0x8c   :  { %688 = vmatpush.bf16.msrb.mxu3 %v1513_v31 }
  0x8d   :  { %vm93_vm2 = vcmp.ge.f32.partialorder %v91_v32, 0.0  ;;  %v95_v33 = vmul.f32 0.2, %v91_v32 }
  0x8e   :  { %611 = vmatpush.bf16.msrb.mxu2 %v1503_v24 }
  0x8f   :  { %v1797_v34 = vsel %vm93_vm2, %v91_v32, %v95_v33  ;;  %v1521_v32 = vld [vmem:[#allocation2 + $0x1b8] sm:$0xff] }
  0x90   :  { %135 = vmatmul.f32.gmra.mxu0 %v1797_v34  ;;  %v99_v38 = vmul.f32 %v1797_v34, %v1797_v34  ;;  %v1529_v33 = vld [vmem:[#allocation2 + $0x1f8] sm:$0xff]  ;;  %767 = vmatpush.bf16.msra.mxu1 %v1521_v32  ;;  %v1522_v32 = vld [vmem:[#allocation2 + $0x1c0] sm:$0xff] }
  0x91   :  { %846 = vmatpush.bf16.msra.mxu0 %v1529_v33 }
  0x92   :  { %612 = vmatpush.bf16.msrb.mxu2 %v1502_v30  ;;  %v1514_v30 = vld [vmem:[#allocation2 + $0x180] sm:$0xff] }
  0x94   :  { %768 = vmatpush.bf16.msra.mxu1 %v1520_v37  ;;  %v1818_v48 = vpop.f32.mrf.mxu1 }
  0x96   :  { %613 = vmatpush.bf16.msrb.mxu2 %v1501_v35 }
  0x98   :  { %138 = vmatmul.f32.gmra.mxu0 %v98_v36  ;;  %v1512_v36 = vld [vmem:[#allocation2 + $0x170] sm:$0xff]  ;;  %769 = vmatpush.bf16.msra.mxu1 %v1519_v43 }
  0x99   :  { %689 = vmatpush.bf16.msrb.mxu3 %v1512_v36 }
  0x9a   :  { %614 = vmatpush.bf16.msrb.mxu2 %v1500_v40 }
  0x9c   :  { %770 = vmatpush.bf16.msra.mxu1 %v1518_v50  ;;  %v215_v20 = vpop.f32.mrf.mxu1 }
  0x9d   :  { %690 = vmatpush.bf16.msrb.mxu3 %v1511_v42 }
  0x9e   :  { %615 = vmatpush.bf16.msrb.mxu2 %v1499_v47 }
  0xa0   :  { %141 = vmatmul.f32.gmra.mxu0 %v99_v38  ;;  %v1528_v38 = vld [vmem:[#allocation2 + $0x1f0] sm:$0xff]  ;;  %771 = vmatpush.bf16.msra.mxu1 %v1517_v58 }
  0xa1   :  { %847 = vmatpush.bf16.msra.mxu0 %v1528_v38  ;;  %691 = vmatpush.bf16.msrb.mxu3 %v1510_v49 }
  0xa2   :  { %616 = vmatpush.bf16.msrb.mxu2 %v1498_v55  ;;  %v1537_v55 = vld [vmem:[#allocation2 + $0x238] sm:$0xff] }
  0xa4   :  { %772 = vmatpush.bf16.msra.mxu1 %v1516_v62  ;;  %v218_v38 = vpop.f32.mrf.mxu1  ;;  %v1004_v62 = vld [vmem:[%s1897_s3] sm:$0xff] }
  0xa5   :  { %848 = vmatpush.bf16.msra.mxu0 %v1527_v44  ;;  %692 = vmatpush.bf16.msrb.mxu3 %v1509_v57 }
  0xa8   :  { %773 = vmatpush.bf16.msra.mxu1 %v1515_v23  ;;  %v1538_v23 = vld [vmem:[%s1900_s6 + $0x4] sm:$0xf] }
  0xa9   :  { %849 = vmatpush.bf16.msra.mxu0 %v1526_v51  ;;  %693 = vmatpush.bf16.msrb.mxu3 %v1508_v61 }
  0xac   :  { %774 = vmatpush.bf16.msra.mxu1 %v1514_v30  ;;  %v221_v50 = vpop.f32.mrf.mxu1 }
  0xad   :  { %850 = vmatpush.bf16.msra.mxu0 %v1525_v59  ;;  %694 = vmatpush.bf16.msrb.mxu3 %v1507_v21 }
  0xb1   :  { %851 = vmatpush.bf16.msra.mxu0 %v1524_v63  ;;  %695 = vmatpush.bf16.msrb.mxu3 %v1506_v28 }
  0xb5   :  { %852 = vmatpush.bf16.msra.mxu0 %v1523_v25 }
  0xb9   :  { %853 = vmatpush.bf16.msra.mxu0 %v1522_v32  ;;  %v1539_v32 = vld [vmem:[%s1900_s6 + $0x4] sm:$0xf0] }
 0x105   :  { %v1812_v6 = vpop.f32.mrf.mxu0 }
 0x106   :  { %v145_v39 = vmul.f32 %v1812_v6, %v1812_v6 }
 0x10d   :  { %v1814_v29 = vpop.f32.mrf.mxu0 }
 0x10e   :  { %v146_v53 = vmul.f32 %v1814_v29, %v1814_v29 }
 0x115   :  { %v139_v41 = vpop.f32.mrf.mxu0 }
 0x116   :  { %v147_v45 = vsub.f32 %v139_v41, %v145_v39  ;;  %v151_v41 = vsub.f32 %v1787_v27, %v1812_v6  ;;  %v1536_v27 = vld [vmem:[#allocation2 + $0x230] sm:$0xff]  ;;  %v1534_v6 = vld [vmem:[#allocation2 + $0x220] sm:$0xff] }
 0x118   :  { %v149_v46 = vmax.f32 %v147_v45, 0.0  ;;  %v152_v45 = vsub.f32 %v1797_v34, %v1814_v29  ;;  %v1535_v34 = vld [vmem:[#allocation2 + $0x228] sm:$0xff]  ;;  %v1533_v29 = vld [vmem:[#allocation2 + $0x218] sm:$0xff] }
 0x11a   :  { %v153_v52 = vadd.f32 1e-08, %v149_v46 }
 0x11c   :  { %1554 = vrsqrt.f32 %v153_v52  ;;  %vm161_vm4 = vweird.f32 %v153_v52 }
 0x11d   :  { %v142_v54 = vpop.f32.mrf.mxu0 }
 0x11e   :  { %v148_v56 = vsub.f32 %v142_v54, %v146_v53 }
 0x120   :  { %v150_v60 = vmax.f32 %v148_v56, 0.0 }
 0x122   :  { %v1555_v0 = vpop.eup %1554  ;;  %v154_v1 = vadd.f32 1e-08, %v150_v60 }
 0x123   :  { %v156_v19 = vmul.f32 %v1555_v0, %v153_v52  ;;  %vm162_vm3 = vweird.f32 %v1555_v0 }
 0x124   :  { %1556 = vrsqrt.f32 %v154_v1  ;;  %vm163_vm5 = vmor %vm161_vm4, %vm162_vm3  ;;  %vm171_vm7 = vweird.f32 %v154_v1 }
 0x125   :  { %v157_v24 = vmul.f32 %v1555_v0, %v156_v19 }
 0x127   :  { %v158_v26 = vmul.f32 0.5, %v157_v24  ;;  %v1457_v24 = vld [vmem:[%s1900_s6 + $0x8] sm:$0xf0] }
 0x128   :  { %v1460_v28 = vor.u32 %v1538_v23, %v1457_v24 }
 0x129   :  { %v159_v31 = vsub.f32 1.5, %v158_v26 }
 0x12a   :  { %v1557_v33 = vpop.eup %1556 }
 0x12b   :  { %v166_v35 = vmul.f32 %v1557_v33, %v154_v1  ;;  %v160_v36 = vmul.f32 %v1555_v0, %v159_v31  ;;  %vm172_vm6 = vweird.f32 %v1557_v33  ;;  %v1455_v31 = vld [vmem:[%s1900_s6] sm:$0xf] }
 0x12c   :  { %vm173_vm8 = vmor %vm171_vm7, %vm172_vm6 }
 0x12d   :  { %v167_v37 = vmul.f32 %v1557_v33, %v166_v35  ;;  %v164_v40 = vsel %vm163_vm5, %v1555_v0, %v160_v36  ;;  %v1005_v0 = vld [vmem:[%s1897_s3 + $0x8] sm:$0xff]  ;;  %v1456_v35 = vor.u32 %v1539_v32, %v1455_v31 }
 0x12e   :  { %v175_v43 = vmul.f32 %v164_v40, %v151_v41 }
 0x12f   :  { %v168_v39 = vmul.f32 0.5, %v167_v37 }
 0x130   :  { %v224_v47 = vmul.f32 %v1818_v48, %v175_v43  ;;  %v1092_v43 = vld [vmem:[%s1899_s5 + $0x10] sm:$0xff] }
 0x131   :  { %v169_v42 = vsub.f32 1.5, %v168_v39 }
 0x132   :  { %v226_v52 = vadd.f32 %v224_v47, %v218_v38  ;;  %v1553_v38 = vld [vmem:[%s1895_s1 + $0x1] ss:$0 sm:$0xff] }
 0x133   :  { %v170_v44 = vmul.f32 %v1557_v33, %v169_v42 }
 0x135   :  { %v174_v46 = vsel %vm173_vm8, %v1557_v33, %v170_v44  ;;  %v1090_v44 = vld [vmem:[%s1899_s5] sm:$0xff] }
 0x136   :  { %v176_v49 = vmul.f32 %v174_v46, %v152_v45 }
 0x138   :  { %v225_v51 = vmul.f32 %v215_v20, %v176_v49 }
 0x13a   :  { %v227_v53 = vadd.f32 %v225_v51, %v221_v50  ;;  %v1093_v51 = vld [vmem:[%s1899_s5 + $0x18] sm:$0xff] }
 0x13c   :  { %v228_v54 = vpack.c.bf16 %v227_v53, %v226_v52  ;;  %v1091_v52 = vld [vmem:[%s1899_s5 + $0x8] sm:$0xff]  ;;  %s1647_s5 = smov [#allocation7]  }
 0x13d   :  { %s1145_s26 = sshll.u32 %s1647_s5, 4  ;;  %s1146_s26 = int_to_ptr.vmem [resolvable:$true] %s1145_s26 }
 0x13e   :  { %301 = vmatmul.bf16.vlgmr.msra.gmra.mxu2 %v228_v54  ;;  %380 = vmatmul.bf16.vlgmr.msra.gmra.mxu3 %v228_v54 }
 0x13f   :  { %459 = vmatmul.bf16.vlgmr.msrb.gmra.mxu1 %v228_v54  ;;  %538 = vmatmul.bf16.vlgmr.msrb.gmra.mxu0 %v228_v54 }
 0x140   :  { %925 = vmatpush.bf16.msra.mxu2 %v1537_v55  ;;  %1029 = vmatpush.msrb.mxu1 %v1720_v2  ;;  %v1532_v2 = vld [vmem:[#allocation2 + $0x210] sm:$0xff] }
 0x141   :  { %1121 = vmatpush.msrb.mxu0 %v1780_v22 }
 0x142   :  { %1030 = vmatpush.msrb.mxu1 %v1723_v3  ;;  %v1531_v3 = vld [vmem:[#allocation2 + $0x208] sm:$0xff] }
 0x144   :  { %926 = vmatpush.bf16.msra.mxu2 %v1536_v27  ;;  %1031 = vmatpush.msrb.mxu1 %v1725_v4  ;;  %v1530_v4 = vld [vmem:[#allocation2 + $0x200] sm:$0xff] }
 0x146   :  { %1032 = vmatpush.msrb.mxu1 %v1728_v5 }
 0x148   :  { %927 = vmatpush.bf16.msra.mxu2 %v1535_v34  ;;  %1033 = vmatpush.msrb.mxu1 %v1734_v7 }
 0x14a   :  { %1034 = vmatpush.msrb.mxu1 %v1737_v8 }
 0x14c   :  { %928 = vmatpush.bf16.msra.mxu2 %v1534_v6  ;;  %1035 = vmatpush.msrb.mxu1 %v1740_v9 }
 0x14e   :  { %617 = vmatmul.bf16.vlgmr.msrb.gmra.mxu2 %v228_v54  ;;  %696 = vmatmul.bf16.vlgmr.msrb.gmra.mxu3 %v228_v54 }
 0x14f   :  { %775 = vmatmul.bf16.vlgmr.msra.gmra.mxu1 %v228_v54  ;;  %854 = vmatmul.bf16.vlgmr.msra.gmra.mxu0 %v228_v54 }
 0x150   :  { %929 = vmatpush.bf16.msra.mxu2 %v1533_v29  ;;  %1036 = vmatpush.msrb.mxu1 %v1743_v10 }
 0x152   :  { %1037 = vmatpush.msrb.mxu1 %v1746_v11 }
 0x154   :  { %930 = vmatpush.bf16.msra.mxu2 %v1532_v2  ;;  %1038 = vmatpush.msrb.mxu1 %v1749_v12 }
 0x156   :  { %1039 = vmatpush.msrb.mxu1 %v1752_v13 }
 0x158   :  { %931 = vmatpush.bf16.msra.mxu2 %v1531_v3  ;;  %1040 = vmatpush.msrb.mxu1 %v1755_v14 }
 0x15a   :  { %1041 = vmatpush.msrb.mxu1 %v1759_v15 }
 0x15c   :  { %932 = vmatpush.bf16.msra.mxu2 %v1530_v4  ;;  %1042 = vmatpush.msrb.mxu1 %v1762_v16 }
 0x15e   :  { %1043 = vmatpush.msrb.mxu1 %v1765_v17  ;;  %v950_v17 = vld [vmem:[%s1901_s7] sm:$0xff] }
 0x15f   :  { %933 = vmatmul.bf16.vlgmr.msra.gmra.mxu2 %v228_v54  ;;  %954 = vperm.xlu1 %1550, %v950_v17  }
 0x160   :  { %1044 = vmatpush.msrb.mxu1 %v1767_v18  ;;  %v951_v18 = vld [vmem:[%s1901_s7 + $0x8] sm:$0xff]  ;;  %1462 = vmatmul.msk.f32.vlgmr.msrb.gmra.mxu0 %vm182_vm0, %v1090_v44 }
 0x161   :  { %959 = vperm.xlu2 %1551, %v951_v18  }
 0x167   :  { %1009 = vperm.xlu1 %1550, %v1004_v62  }
 0x168   :  { %1463 = vmatmul.msk.f32.gmra.mxu0 %vm182_vm0, %v1091_v52 }
 0x169   :  { %1014 = vperm.xlu2 %1551, %v1005_v0  }
 0x1bb   :  { %v960_v37 = vpop.permute.xlu2 %959 }
 0x1bc   :  { %v460_v5 = vpop.f32.mrf.mxu1  ;;  %v539_v7 = vpop.f32.mrf.mxu0 }
 0x1c1   :  { %v302_v8 = vpop.f32.mrf.mxu2  ;;  %v381_v9 = vpop.f32.mrf.mxu3 }
 0x1c3   :  { %v1015_v49 = vpop.permute.xlu2 %1014 }
 0x1c4   :  { %v462_v10 = vpop.f32.mrf.mxu1  ;;  %v541_v11 = vpop.f32.mrf.mxu0  ;;  %v1018_v27 = vmul.f32 %v1553_v38, %v1015_v49 }
 0x1c5   :  { %v942_v20 = vpack.c.bf16 %v541_v11, %v539_v7  ;;  %v941_v21 = vpack.c.bf16 %v462_v10, %v460_v5 }
 0x1c9   :  { %v304_v12 = vpop.f32.mrf.mxu2  ;;  %v383_v13 = vpop.f32.mrf.mxu3 }
 0x1ca   :  { %v940_v30 = vpack.c.bf16 %v383_v13, %v381_v9  ;;  %v939_v33 = vpack.c.bf16 %v304_v12, %v302_v8 }
 0x1cc   :  { %v776_v48 = vpop.f32.mrf.mxu1  ;;  %v855_v14 = vpop.f32.mrf.mxu0 }
 0x1d1   :  { %v618_v56 = vpop.f32.mrf.mxu2  ;;  %v697_v15 = vpop.f32.mrf.mxu3 }
 0x1d2   :  { %v955_v36 = vpop.permute.xlu1 %954 }
 0x1d4   :  { %v857_v57 = vpop.f32.mrf.mxu0  ;;  %v778_v16 = vpop.f32.mrf.mxu1 }
 0x1d5   :  { %v946_v58 = vpack.c.bf16 %v857_v57, %v855_v14  ;;  %v945_v59 = vpack.c.bf16 %v778_v16, %v776_v48 }
 0x1d7   :  { %975 = vmatpush.bf16.msra.mxu3 %v946_v58 }
 0x1d9   :  { %v620_v60 = vpop.f32.mrf.mxu2  ;;  %v699_v61 = vpop.f32.mrf.mxu3 }
 0x1da   :  { %v944_v63 = vpack.c.bf16 %v699_v61, %v697_v15  ;;  %v943_v1 = vpack.c.bf16 %v620_v60, %v618_v56  ;;  %v1010_v39 = vpop.permute.xlu1 %1009 }
 0x1db   :  { %976 = vmatpush.bf16.msra.mxu3 %v945_v59 }
 0x1dd   :  { %v1123_v62 = vpop.f32.mrf.mxu0 }
 0x1df   :  { %977 = vmatpush.bf16.msra.mxu3 %v944_v63 }
 0x1e2   :  { %v934_v19 = vpop.f32.mrf.mxu2 }
 0x1e3   :  { %978 = vmatpush.bf16.msra.mxu3 %v943_v1 }
 0x1e5   :  { %v1126_v31 = vpop.f32.mrf.mxu0 }
 0x1e7   :  { %979 = vmatpush.bf16.msra.mxu3 %v942_v20 }
 0x1ea   :  { %v936_v25 = vpop.f32.mrf.mxu2 }
 0x1eb   :  { %v947_v26 = vpack.c.bf16 %v936_v25, %v934_v19  ;;  %980 = vmatpush.bf16.msra.mxu3 %v941_v21 }
 0x1ed   :  { %996 = vmatpush.bf16.msrb.mxu2 %v947_v26 }
 0x1ef   :  { %981 = vmatpush.bf16.msra.mxu3 %v940_v30 }
 0x1f0   :  { %1461 = vmatmul.msk.bf16.vlgmr.msrb.gmra.mxu2 %vm971_vm9, %v1460_v28 }
 0x1f3   :  { %982 = vmatpush.bf16.msra.mxu3 %v939_v33 }
 0x1f6   :  { %983 = vmatmul.bf16.vlgmr.msra.gmra.mxu3 %v1456_v35 }
 0x1f7   :  { %1540 = vmatpush.msrb.mxu3 %v1780_v22  ;;  %v1017_v22 = vmul.f32 %v1553_v38, %v1010_v39 }
 0x206   :  { %1464 = vmatmul.msk.f32.vlgmr.msrb.gmra.mxu3 %vm182_vm0, %v1092_v43 }
 0x20e   :  { %1465 = vmatmul.msk.f32.gmra.mxu3 %vm182_vm0, %v1093_v51 }
 0x273   :  { %v998_v40 = vpop.f32.mrf.mxu2 }
 0x279   :  { %v984_v41 = vpop.f32.mrf.mxu3 }
 0x27a   :  { %v985_v42 = vadd.f32 %v984_v41, %v955_v36 }
 0x27b   :  { %v1000_v55 = vpop.f32.mrf.mxu2 }
 0x27c   :  { %v999_v45 = vadd.f32 %v998_v40, %v985_v42 }
 0x27e   :  { %v1019_v46 = vadd.f32 %v1017_v22, %v999_v45 }
 0x280   :  { %vm1021_vm10 = vcmp.ge.f32.partialorder %v1019_v46, 0.0  ;;  %v1023_v47 = vmul.f32 0.2, %v1019_v46 }
 0x281   :  { %v986_v50 = vpop.f32.mrf.mxu3 }
 0x282   :  { %v987_v53 = vadd.f32 %v986_v50, %v960_v37  ;;  %v1025_v54 = vsel %vm1021_vm10, %v1019_v46, %v1023_v47 }
 0x283   :  { %1045 = vmatmul.f32.vlgmr.msrb.gmra.mxu1 %v1025_v54  ;;  %v1027_v3 = vmul.f32 %v1025_v54, %v1025_v54 }
 0x284   :  { %v1001_v34 = vadd.f32 %v1000_v55, %v987_v53 }
 0x286   :  { %v1020_v6 = vadd.f32 %v1018_v27, %v1001_v34 }
 0x288   :  { %vm1022_vm11 = vcmp.ge.f32.partialorder %v1020_v6, 0.0  ;;  %v1024_v29 = vmul.f32 0.2, %v1020_v6 }
 0x289   :  { %v1129_v19 = vpop.f32.mrf.mxu3 }
 0x28a   :  { %v1026_v2 = vsel %vm1022_vm11, %v1020_v6, %v1024_v29 }
 0x28b   :  { %1048 = vmatmul.f32.gmra.mxu1 %v1026_v2  ;;  %v1028_v4 = vmul.f32 %v1026_v2, %v1026_v2 }
 0x291   :  { %v1132_v33 = vpop.f32.mrf.mxu3 }
 0x293   :  { %1051 = vmatmul.f32.gmra.mxu1 %v1027_v3 }
 0x29b   :  { %1054 = vmatmul.f32.gmra.mxu1 %v1028_v4 }
 0x300   :  { %v1046_v5 = vpop.f32.mrf.mxu1 }
 0x301   :  { %v1058_v8 = vmul.f32 %v1046_v5, %v1046_v5  ;;  %v1064_v63 = vsub.f32 %v1025_v54, %v1046_v5 }
 0x308   :  { %v1049_v7 = vpop.f32.mrf.mxu1 }
 0x309   :  { %v1059_v13 = vmul.f32 %v1049_v7, %v1049_v7  ;;  %v1065_v28 = vsub.f32 %v1026_v2, %v1049_v7 }
 0x310   :  { %v1052_v9 = vpop.f32.mrf.mxu1 }
 0x311   :  { %v1060_v10 = vsub.f32 %v1052_v9, %v1058_v8 }
 0x313   :  { %v1062_v11 = vmax.f32 %v1060_v10, 0.0 }
 0x315   :  { %v1066_v12 = vadd.f32 1e-08, %v1062_v11 }
 0x317   :  { %1558 = vrsqrt.f32 %v1066_v12  ;;  %vm1074_vm13 = vweird.f32 %v1066_v12 }
 0x318   :  { %v1055_v48 = vpop.f32.mrf.mxu1 }
 0x319   :  { %v1061_v14 = vsub.f32 %v1055_v48, %v1059_v13 }
 0x31b   :  { %v1063_v56 = vmax.f32 %v1061_v14, 0.0 }
 0x31d   :  { %v1559_v15 = vpop.eup %1558  ;;  %v1067_v57 = vadd.f32 1e-08, %v1063_v56 }
 0x31e   :  { %v1069_v58 = vmul.f32 %v1559_v15, %v1066_v12  ;;  %vm1075_vm12 = vweird.f32 %v1559_v15 }
 0x31f   :  { %1560 = vrsqrt.f32 %v1067_v57  ;;  %vm1076_vm14 = vmor %vm1074_vm13, %vm1075_vm12  ;;  %vm1084_vm0 = vweird.f32 %v1067_v57 }
 0x320   :  { %v1070_v16 = vmul.f32 %v1559_v15, %v1069_v58 }
 0x322   :  { %v1071_v17 = vmul.f32 0.5, %v1070_v16 }
 0x324   :  { %v1072_v18 = vsub.f32 1.5, %v1071_v17 }
 0x325   :  { %v1561_v59 = vpop.eup %1560 }
 0x326   :  { %v1079_v60 = vmul.f32 %v1561_v59, %v1067_v57  ;;  %v1073_v61 = vmul.f32 %v1559_v15, %v1072_v18  ;;  %vm1085_vm15 = vweird.f32 %v1561_v59 }
 0x327   :  { %vm1086_vm1 = vmor %vm1084_vm0, %vm1085_vm15 }
 0x328   :  { %v1080_v0 = vmul.f32 %v1561_v59, %v1079_v60  ;;  %v1077_v1 = vsel %vm1076_vm14, %v1559_v15, %v1073_v61 }
 0x329   :  { %v1088_v20 = vmul.f32 %v1077_v1, %v1064_v63 }
 0x32a   :  { %v1081_v21 = vmul.f32 0.5, %v1080_v0 }
 0x32b   :  { %v1135_v23 = vmul.f32 %v1123_v62, %v1088_v20 }
 0x32c   :  { %v1082_v24 = vsub.f32 1.5, %v1081_v21 }
 0x32d   :  { %v1137_v25 = vadd.f32 %v1135_v23, %v1129_v19 }
 0x32e   :  { %v1083_v26 = vmul.f32 %v1561_v59, %v1082_v24 }
 0x32f   :  { %1139 = vst [vmem:[#allocation7] sm:$0xff] %v1137_v25 }
 0x330   :  { %v1087_v30 = vsel %vm1086_vm1, %v1561_v59, %v1083_v26 }
 0x331   :  { %v1089_v32 = vmul.f32 %v1087_v30, %v1065_v28 }
 0x333   :  { %v1136_v35 = vmul.f32 %v1126_v31, %v1089_v32 }
 0x335   :  { %v1138_v36 = vadd.f32 %v1136_v35, %v1132_v33 }
 0x337   :  { %1140 = vst [vmem:[#allocation7 + $0x8] sm:$0xff] %v1138_v36 }
 0x338   :  { %1153 = dma.vmem_to_hbm [thread:$0]  %s1146_s26, 256, %s1148_s28, [#allocation4], %s1644_s29, %s1644_s29, %s1645_s30  }
 0x339   :  { %1638 = dma.done.wait [#allocation4], 256  }
 0x33a   :  { %1639 = vsyncadd [#allocation4], 4294967040 }
 0x33b   :  { %1158 = vsyncpa [#allocation3], 1 }
 0x33c   :  { %1159 = vsyncpa [#allocation6], 1 }
 0x33d   :  { %1160 = vsyncpa [#allocation4], 1 }

// kernel: tpu_custom_call.1
= control target key start
LH: loop header
LB: loop body
LE: loop exit
PB: predicated region body
PF: predicated region fallthrough
CT: control target
= control target key end

     0   :  { %16 = vsyncpa [#allocation3], 0  ;;  %s1894_s0 = inlined_call_operand.vmem [shape: f32[16,128], index: 0, kind: input, shape index: {}]   ;;  %s1895_s1 = inlined_call_operand.vmem [shape: f32[1,2,128], index: 1, kind: input, shape index: {}]   ;;  %s1896_s2 = inlined_call_operand.vmem [shape: f32[16,1], index: 2, kind: input, shape index: {}]   ;;  %s1897_s3 = inlined_call_operand.vmem [shape: f32[16,1], index: 3, kind: input, shape index: {}]   ;;  %s1898_s4 = inlined_call_operand.vmem [shape: f32[1,32,8], index: 4, kind: input, shape index: {}]   ;;  %s1899_s5 = inlined_call_operand.vmem [shape: f32[1,32,8], index: 5, kind: input, shape index: {}]   ;;  %s1900_s6 = inlined_call_operand.vmem [shape: bf16[16,144], index: 6, kind: input, shape index: {}]   ;;  %s1901_s7 = inlined_call_operand.vmem [shape: f32[16,1], index: 7, kind: input, shape index: {}]   ;;  %s1902_s8 = inlined_call_operand.hbm [shape: bf16[9,128,128], index: 8, kind: input, shape index: {}]   ;;  %s1903_s9 = inlined_call_operand.hbm [shape: f32[128,128], index: 9, kind: input, shape index: {}]   ;;  %s1904_s10 = inlined_call_operand.vmem [shape: f32[8,128], index: 10, kind: input, shape index: {}]   ;;  %s1905_s11 = inlined_call_operand.hbm [shape: f32[1,16,128], index: 11, kind: output, shape index: {}]  }
   0x1   :  { %17 = vsyncpa [#allocation6], 0 }
   0x2   :  { %18 = vsyncpa [#allocation4], 0  ;;  %s39_s19 = sshll.u32 %s1902_s8, 4  ;;  %s1640_s20 = smov [#allocation2]   ;;  %s40_s19 = int_to_ptr.hbm [resolvable:$true] %s39_s19 }
   0x3   :  { %s41_s21 = sshll.u32 %s1640_s20, 4  ;;  %s52_s24 = sshll.u32 %s1903_s9, 4  ;;  %s42_s21 = int_to_ptr.vmem [resolvable:$true] %s41_s21  ;;  %s53_s24 = int_to_ptr.hbm [resolvable:$true] %s52_s24 }
   0x4   :  { %s1641_s25 = smov 64   ;;  %s1642_s26 = smov 4  }
   0x5   :  { %47 = dma.hbm_to_vmem [thread:$0]  %s40_s19, 9216, %s42_s21, [#allocation3], %s1641_s25, %s1641_s25, %s1642_s26  }
   0x6   :  { %s1643_s27 = smov [#allocation5]   ;;  %s1644_s29 = smov 128  }
   0x7   :  { %s54_s28 = sshll.u32 %s1643_s27, 4  ;;  %s1645_s30 = smov 8   ;;  %s55_s28 = int_to_ptr.vmem [resolvable:$true] %s54_s28 }
   0x8   :  { %60 = dma.hbm_to_vmem [thread:$0]  %s53_s24, 2048, %s55_s28, [#allocation6], %s1644_s29, %s1644_s29, %s1645_s30  }
   0x9   :  { %1634 = dma.done.wait [#allocation3], 9216  }
   0xa   :  { %1635 = vsyncadd [#allocation3], 4294958080 }
   0xb   :  { %1636 = dma.done.wait [#allocation6], 2048  }
   0xc   :  { %1637 = vsyncadd [#allocation6], 4294965248  ;;  %v1646_v0 = vmov 0   ;;  %v75_v1 = vld [vmem:[%s1896_s2] sm:$0xff]  ;;  %v1720_v2 = vld [vmem:[#allocation5 + $0x78] sm:$0xff]  ;;  %vm182_vm0 = vcmask 64512  }
   0xd   :  { %1549 = vset.pattern.permute.xlu0 %v1646_v0  ;;  %1550 = vset.pattern.permute.xlu1 %v1646_v0  ;;  %v1723_v3 = vld [vmem:[#allocation5 + $0x70] sm:$0xff]  ;;  %v1725_v4 = vld [vmem:[#allocation5 + $0x68] sm:$0xff]  ;;  %v1728_v5 = vld [vmem:[#allocation5 + $0x60] sm:$0xff]  ;;  %vm971_vm9 = vcmask 130048   ;;  %s1147_s28 = sshll.u32 %s1905_s11, 4  ;;  %s1148_s28 = int_to_ptr.hbm [resolvable:$true] %s1147_s28 }
   0xe   :  { %1551 = vset.pattern.permute.xlu2 %v1646_v0  ;;  %80 = vperm.xlu0 %1549, %v75_v1   ;;  %v76_v6 = vld [vmem:[%s1896_s2 + $0x8] sm:$0xff]  ;;  %v1734_v7 = vld [vmem:[#allocation5 + $0x58] sm:$0xff]  ;;  %v1737_v8 = vld [vmem:[#allocation5 + $0x50] sm:$0xff] }
   0xf   :  { %116 = vmatpush.msra.mxu0 %v1720_v2  ;;  %v1740_v9 = vld [vmem:[#allocation5 + $0x48] sm:$0xff]  ;;  %v1743_v10 = vld [vmem:[#allocation5 + $0x40] sm:$0xff]  ;;  %v1746_v11 = vld [vmem:[#allocation5 + $0x38] sm:$0xff] }
  0x10   :  { %v1749_v12 = vld [vmem:[#allocation5 + $0x30] sm:$0xff]  ;;  %v1752_v13 = vld [vmem:[#allocation5 + $0x28] sm:$0xff]  ;;  %v1755_v14 = vld [vmem:[#allocation5 + $0x20] sm:$0xff] }
  0x11   :  { %117 = vmatpush.msra.mxu0 %v1723_v3  ;;  %v1759_v15 = vld [vmem:[#allocation5 + $0x18] sm:$0xff]  ;;  %v1762_v16 = vld [vmem:[#allocation5 + $0x10] sm:$0xff]  ;;  %v1765_v17 = vld [vmem:[#allocation5 + $0x8] sm:$0xff] }
  0x12   :  { %v1767_v18 = vld [vmem:[#allocation5] sm:$0xff]  ;;  %v178_v28 = vld [vmem:[%s1898_s4 + $0x8] sm:$0xff]  ;;  %v179_v35 = vld [vmem:[%s1898_s4 + $0x10] sm:$0xff] }
  0x13   :  { %118 = vmatpush.msra.mxu0 %v1725_v4  ;;  %v1552_v19 = vld [vmem:[%s1895_s1] ss:$0 sm:$0xff]  ;;  %v73_v30 = vld [vmem:[%s1894_s0 + $0x8] sm:$0xff]  ;;  %v180_v37 = vld [vmem:[%s1898_s4 + $0x18] sm:$0xff] }
  0x14   :  { %v72_v21 = vld [vmem:[%s1894_s0] sm:$0xff]  ;;  %v1473_v39 = vld [vmem:[#allocation2 + $0x38] sm:$0xff]  ;;  %v1472_v40 = vld [vmem:[#allocation2 + $0x30] sm:$0xff] }
  0x15   :  { %119 = vmatpush.msra.mxu0 %v1728_v5  ;;  %v1780_v22 = vld [vmem:[%s1904_s10] sm:$0xff]  ;;  %293 = vmatpush.bf16.msra.mxu2 %v1473_v39  ;;  %v1471_v41 = vld [vmem:[#allocation2 + $0x28] sm:$0xff]  ;;  %v1481_v43 = vld [vmem:[#allocation2 + $0x78] sm:$0xff] }
  0x16   :  { %85 = vperm.xlu0 %1549, %v76_v6   ;;  %v177_v23 = vld [vmem:[%s1898_s4] sm:$0xff]  ;;  %210 = vmatpush.msra.mxu1 %v1780_v22  ;;  %v1489_v44 = vld [vmem:[#allocation2 + $0xb8] sm:$0xff]  ;;  %v1480_v47 = vld [vmem:[#allocation2 + $0x70] sm:$0xff] }
  0x17   :  { %120 = vmatpush.msra.mxu0 %v1734_v7  ;;  %1161 = vmatmul.msk.f32.vlgmr.msra.gmra.mxu1 %vm182_vm0, %v177_v23  ;;  %v1470_v42 = vld [vmem:[#allocation2 + $0x20] sm:$0xff]  ;;  %v1497_v45 = vld [vmem:[#allocation2 + $0xf8] sm:$0xff]  ;;  %v1488_v48 = vld [vmem:[#allocation2 + $0xb0] sm:$0xff] }
  0x18   :  { %372 = vmatpush.bf16.msra.mxu3 %v1481_v43  ;;  %451 = vmatpush.bf16.msrb.mxu1 %v1489_v44  ;;  %v1469_v46 = vld [vmem:[#allocation2 + $0x18] sm:$0xff]  ;;  %v1496_v49 = vld [vmem:[#allocation2 + $0xf0] sm:$0xff]  ;;  %v1479_v51 = vld [vmem:[#allocation2 + $0x68] sm:$0xff] }
  0x19   :  { %121 = vmatpush.msra.mxu0 %v1737_v8  ;;  %294 = vmatpush.bf16.msra.mxu2 %v1472_v40  ;;  %v1468_v50 = vld [vmem:[#allocation2 + $0x10] sm:$0xff]  ;;  %v1487_v52 = vld [vmem:[#allocation2 + $0xa8] sm:$0xff]  ;;  %v1478_v55 = vld [vmem:[#allocation2 + $0x60] sm:$0xff] }
  0x1a   :  { %v1495_v53 = vld [vmem:[#allocation2 + $0xe8] sm:$0xff]  ;;  %v1486_v56 = vld [vmem:[#allocation2 + $0xa0] sm:$0xff]  ;;  %v1477_v59 = vld [vmem:[#allocation2 + $0x58] sm:$0xff] }
  0x1b   :  { %122 = vmatpush.msra.mxu0 %v1740_v9  ;;  %v1467_v54 = vld [vmem:[#allocation2 + $0x8] sm:$0xff]  ;;  %v1494_v57 = vld [vmem:[#allocation2 + $0xe0] sm:$0xff]  ;;  %v1485_v60 = vld [vmem:[#allocation2 + $0x98] sm:$0xff] }
  0x1c   :  { %373 = vmatpush.bf16.msra.mxu3 %v1480_v47  ;;  %452 = vmatpush.bf16.msrb.mxu1 %v1488_v48  ;;  %v1466_v58 = vld [vmem:[#allocation2] sm:$0xff]  ;;  %v1493_v61 = vld [vmem:[#allocation2 + $0xd8] sm:$0xff]  ;;  %v1476_v63 = vld [vmem:[#allocation2 + $0x50] sm:$0xff] }
  0x1d   :  { %123 = vmatpush.msra.mxu0 %v1743_v10  ;;  %295 = vmatpush.bf16.msra.mxu2 %v1471_v41  ;;  %v1505_v62 = vld [vmem:[#allocation2 + $0x138] sm:$0xff]  ;;  %v1484_v0 = vld [vmem:[#allocation2 + $0x90] sm:$0xff]  ;;  %v1491_v23 = vld [vmem:[#allocation2 + $0xc8] sm:$0xff] }
  0x1e   :  { %v1492_v1 = vld [vmem:[#allocation2 + $0xd0] sm:$0xff]  ;;  %v1519_v43 = vld [vmem:[#allocation2 + $0x1a8] sm:$0xff] }
  0x1f   :  { %124 = vmatpush.msra.mxu0 %v1746_v11  ;;  %1162 = vmatmul.msk.f32.gmra.mxu1 %vm182_vm0, %v178_v28  ;;  %v1490_v28 = vld [vmem:[#allocation2 + $0xc0] sm:$0xff]  ;;  %v1500_v40 = vld [vmem:[#allocation2 + $0x110] sm:$0xff]  ;;  %v1527_v44 = vld [vmem:[#allocation2 + $0x1e8] sm:$0xff] }
  0x20   :  { %374 = vmatpush.bf16.msra.mxu3 %v1479_v51  ;;  %453 = vmatpush.bf16.msrb.mxu1 %v1487_v52  ;;  %v1499_v47 = vld [vmem:[#allocation2 + $0x108] sm:$0xff]  ;;  %v1526_v51 = vld [vmem:[#allocation2 + $0x1e0] sm:$0xff] }
  0x21   :  { %125 = vmatpush.msra.mxu0 %v1749_v12  ;;  %296 = vmatpush.bf16.msra.mxu2 %v1470_v42  ;;  %v1511_v42 = vld [vmem:[#allocation2 + $0x168] sm:$0xff] }
  0x23   :  { %126 = vmatpush.msra.mxu0 %v1752_v13 }
  0x24   :  { %375 = vmatpush.bf16.msra.mxu3 %v1478_v55  ;;  %454 = vmatpush.bf16.msrb.mxu1 %v1486_v56  ;;  %v1498_v55 = vld [vmem:[#allocation2 + $0x100] sm:$0xff] }
  0x25   :  { %127 = vmatpush.msra.mxu0 %v1755_v14  ;;  %297 = vmatpush.bf16.msra.mxu2 %v1469_v46 }
  0x27   :  { %128 = vmatpush.msra.mxu0 %v1759_v15  ;;  %1163 = vmatmul.msk.f32.gmra.mxu1 %vm182_vm0, %v179_v35  ;;  %v1501_v35 = vld [vmem:[#allocation2 + $0x118] sm:$0xff] }
  0x28   :  { %376 = vmatpush.bf16.msra.mxu3 %v1477_v59  ;;  %455 = vmatpush.bf16.msrb.mxu1 %v1485_v60  ;;  %v1525_v59 = vld [vmem:[#allocation2 + $0x1d8] sm:$0xff] }
  0x29   :  { %129 = vmatpush.msra.mxu0 %v1762_v16  ;;  %298 = vmatpush.bf16.msra.mxu2 %v1468_v50  ;;  %v1518_v50 = vld [vmem:[#allocation2 + $0x1a0] sm:$0xff] }
  0x2b   :  { %130 = vmatpush.msra.mxu0 %v1765_v17 }
  0x2c   :  { %377 = vmatpush.bf16.msra.mxu3 %v1476_v63  ;;  %456 = vmatpush.bf16.msrb.mxu1 %v1484_v0  ;;  %v1524_v63 = vld [vmem:[#allocation2 + $0x1d0] sm:$0xff] }
  0x2d   :  { %131 = vmatpush.msra.mxu0 %v1767_v18  ;;  %299 = vmatpush.bf16.msra.mxu2 %v1467_v54 }
  0x2f   :  { %1164 = vmatmul.msk.f32.gmra.mxu1 %vm182_vm0, %v180_v37  ;;  %530 = vmatpush.bf16.msrb.mxu0 %v1497_v45  ;;  %v1520_v37 = vld [vmem:[#allocation2 + $0x1b0] sm:$0xff] }
  0x31   :  { %300 = vmatpush.bf16.msra.mxu2 %v1466_v58  ;;  %v1517_v58 = vld [vmem:[#allocation2 + $0x198] sm:$0xff] }
  0x33   :  { %531 = vmatpush.bf16.msrb.mxu0 %v1496_v49  ;;  %v1510_v49 = vld [vmem:[#allocation2 + $0x160] sm:$0xff] }
  0x35   :  { %609 = vmatpush.bf16.msrb.mxu2 %v1505_v62  ;;  %v1516_v62 = vld [vmem:[#allocation2 + $0x190] sm:$0xff] }
  0x37   :  { %532 = vmatpush.bf16.msrb.mxu0 %v1495_v53 }
  0x3b   :  { %533 = vmatpush.bf16.msrb.mxu0 %v1494_v57  ;;  %v1509_v57 = vld [vmem:[#allocation2 + $0x158] sm:$0xff] }
  0x3f   :  { %534 = vmatpush.bf16.msrb.mxu0 %v1493_v61  ;;  %v1508_v61 = vld [vmem:[#allocation2 + $0x150] sm:$0xff] }
  0x43   :  { %535 = vmatpush.bf16.msrb.mxu0 %v1492_v1 }
  0x47   :  { %536 = vmatpush.bf16.msrb.mxu0 %v1491_v23  ;;  %v1515_v23 = vld [vmem:[#allocation2 + $0x188] sm:$0xff] }
  0x4b   :  { %537 = vmatpush.bf16.msrb.mxu0 %v1490_v28  ;;  %v1506_v28 = vld [vmem:[#allocation2 + $0x140] sm:$0xff] }
  0x80   :  { %v81_v20 = vpop.permute.xlu0 %80 }
  0x81   :  { %v88_v24 = vmul.f32 %v1552_v19, %v81_v20  ;;  %v1475_v20 = vld [vmem:[#allocation2 + $0x48] sm:$0xff] }
  0x82   :  { %378 = vmatpush.bf16.msra.mxu3 %v1475_v20 }
  0x83   :  { %v90_v25 = vadd.f32 %v88_v24, %v72_v21  ;;  %v1483_v21 = vld [vmem:[#allocation2 + $0x88] sm:$0xff] }
  0x84   :  { %v1503_v24 = vld [vmem:[#allocation2 + $0x128] sm:$0xff]  ;;  %457 = vmatpush.bf16.msrb.mxu1 %v1483_v21 }
  0x85   :  { %vm92_vm1 = vcmp.ge.f32.partialorder %v90_v25, 0.0  ;;  %v94_v26 = vmul.f32 0.2, %v90_v25  ;;  %v1507_v21 = vld [vmem:[#allocation2 + $0x148] sm:$0xff] }
  0x87   :  { %v1787_v27 = vsel %vm92_vm1, %v90_v25, %v94_v26  ;;  %v1474_v25 = vld [vmem:[#allocation2 + $0x40] sm:$0xff] }
  0x88   :  { %v86_v29 = vpop.permute.xlu0 %85  ;;  %132 = vmatmul.f32.vlgmr.msra.gmra.mxu0 %v1787_v27  ;;  %v98_v36 = vmul.f32 %v1787_v27, %v1787_v27  ;;  %v1482_v26 = vld [vmem:[#allocation2 + $0x80] sm:$0xff]  ;;  %379 = vmatpush.bf16.msra.mxu3 %v1474_v25  ;;  %v1523_v25 = vld [vmem:[#allocation2 + $0x1c8] sm:$0xff] }
  0x89   :  { %v89_v31 = vmul.f32 %v1552_v19, %v86_v29  ;;  %v1504_v19 = vld [vmem:[#allocation2 + $0x130] sm:$0xff]  ;;  %458 = vmatpush.bf16.msrb.mxu1 %v1482_v26 }
  0x8a   :  { %610 = vmatpush.bf16.msrb.mxu2 %v1504_v19 }
  0x8b   :  { %v91_v32 = vadd.f32 %v89_v31, %v73_v30  ;;  %v1502_v30 = vld [vmem:[#allocation2 + $0x120] sm:$0xff]  ;;  %v1513_v31 = vld [vmem:[#allocation2 + $0x178] sm:$0xff] }
  0x8c   :  { %688 = vmatpush.bf16.msrb.mxu3 %v1513_v31 }
  0x8d   :  { %vm93_vm2 = vcmp.ge.f32.partialorder %v91_v32, 0.0  ;;  %v95_v33 = vmul.f32 0.2, %v91_v32 }
  0x8e   :  { %611 = vmatpush.bf16.msrb.mxu2 %v1503_v24 }
  0x8f   :  { %v1797_v34 = vsel %vm93_vm2, %v91_v32, %v95_v33  ;;  %v1521_v32 = vld [vmem:[#allocation2 + $0x1b8] sm:$0xff] }
  0x90   :  { %135 = vmatmul.f32.gmra.mxu0 %v1797_v34  ;;  %v99_v38 = vmul.f32 %v1797_v34, %v1797_v34  ;;  %v1529_v33 = vld [vmem:[#allocation2 + $0x1f8] sm:$0xff]  ;;  %767 = vmatpush.bf16.msra.mxu1 %v1521_v32  ;;  %v1522_v32 = vld [vmem:[#allocation2 + $0x1c0] sm:$0xff] }
  0x91   :  { %846 = vmatpush.bf16.msra.mxu0 %v1529_v33 }
  0x92   :  { %612 = vmatpush.bf16.msrb.mxu2 %v1502_v30  ;;  %v1514_v30 = vld [vmem:[#allocation2 + $0x180] sm:$0xff] }
  0x94   :  { %768 = vmatpush.bf16.msra.mxu1 %v1520_v37  ;;  %v1818_v48 = vpop.f32.mrf.mxu1 }
  0x96   :  { %613 = vmatpush.bf16.msrb.mxu2 %v1501_v35 }
  0x98   :  { %138 = vmatmul.f32.gmra.mxu0 %v98_v36  ;;  %v1512_v36 = vld [vmem:[#allocation2 + $0x170] sm:$0xff]  ;;  %769 = vmatpush.bf16.msra.mxu1 %v1519_v43 }
  0x99   :  { %689 = vmatpush.bf16.msrb.mxu3 %v1512_v36 }
  0x9a   :  { %614 = vmatpush.bf16.msrb.mxu2 %v1500_v40 }
  0x9c   :  { %770 = vmatpush.bf16.msra.mxu1 %v1518_v50  ;;  %v215_v20 = vpop.f32.mrf.mxu1 }
  0x9d   :  { %690 = vmatpush.bf16.msrb.mxu3 %v1511_v42 }
  0x9e   :  { %615 = vmatpush.bf16.msrb.mxu2 %v1499_v47 }
  0xa0   :  { %141 = vmatmul.f32.gmra.mxu0 %v99_v38  ;;  %v1528_v38 = vld [vmem:[#allocation2 + $0x1f0] sm:$0xff]  ;;  %771 = vmatpush.bf16.msra.mxu1 %v1517_v58 }
  0xa1   :  { %847 = vmatpush.bf16.msra.mxu0 %v1528_v38  ;;  %691 = vmatpush.bf16.msrb.mxu3 %v1510_v49 }
  0xa2   :  { %616 = vmatpush.bf16.msrb.mxu2 %v1498_v55  ;;  %v1537_v55 = vld [vmem:[#allocation2 + $0x238] sm:$0xff] }
  0xa4   :  { %772 = vmatpush.bf16.msra.mxu1 %v1516_v62  ;;  %v218_v38 = vpop.f32.mrf.mxu1  ;;  %v1004_v62 = vld [vmem:[%s1897_s3] sm:$0xff] }
  0xa5   :  { %848 = vmatpush.bf16.msra.mxu0 %v1527_v44  ;;  %692 = vmatpush.bf16.msrb.mxu3 %v1509_v57 }
  0xa8   :  { %773 = vmatpush.bf16.msra.mxu1 %v1515_v23  ;;  %v1538_v23 = vld [vmem:[%s1900_s6 + $0x4] sm:$0xf] }
  0xa9   :  { %849 = vmatpush.bf16.msra.mxu0 %v1526_v51  ;;  %693 = vmatpush.bf16.msrb.mxu3 %v1508_v61 }
  0xac   :  { %774 = vmatpush.bf16.msra.mxu1 %v1514_v30  ;;  %v221_v50 = vpop.f32.mrf.mxu1 }
  0xad   :  { %850 = vmatpush.bf16.msra.mxu0 %v1525_v59  ;;  %694 = vmatpush.bf16.msrb.mxu3 %v1507_v21 }
  0xb1   :  { %851 = vmatpush.bf16.msra.mxu0 %v1524_v63  ;;  %695 = vmatpush.bf16.msrb.mxu3 %v1506_v28 }
  0xb5   :  { %852 = vmatpush.bf16.msra.mxu0 %v1523_v25 }
  0xb9   :  { %853 = vmatpush.bf16.msra.mxu0 %v1522_v32  ;;  %v1539_v32 = vld [vmem:[%s1900_s6 + $0x4] sm:$0xf0] }
 0x105   :  { %v1812_v6 = vpop.f32.mrf.mxu0 }
 0x106   :  { %v145_v39 = vmul.f32 %v1812_v6, %v1812_v6 }
 0x10d   :  { %v1814_v29 = vpop.f32.mrf.mxu0 }
 0x10e   :  { %v146_v53 = vmul.f32 %v1814_v29, %v1814_v29 }
 0x115   :  { %v139_v41 = vpop.f32.mrf.mxu0 }
 0x116   :  { %v147_v45 = vsub.f32 %v139_v41, %v145_v39  ;;  %v151_v41 = vsub.f32 %v1787_v27, %v1812_v6  ;;  %v1536_v27 = vld [vmem:[#allocation2 + $0x230] sm:$0xff]  ;;  %v1534_v6 = vld [vmem:[#allocation2 + $0x220] sm:$0xff] }
 0x118   :  { %v149_v46 = vmax.f32 %v147_v45, 0.0  ;;  %v152_v45 = vsub.f32 %v1797_v34, %v1814_v29  ;;  %v1535_v34 = vld [vmem:[#allocation2 + $0x228] sm:$0xff]  ;;  %v1533_v29 = vld [vmem:[#allocation2 + $0x218] sm:$0xff] }
 0x11a   :  { %v153_v52 = vadd.f32 1e-08, %v149_v46 }
 0x11c   :  { %1554 = vrsqrt.f32 %v153_v52  ;;  %vm161_vm4 = vweird.f32 %v153_v52 }
 0x11d   :  { %v142_v54 = vpop.f32.mrf.mxu0 }
 0x11e   :  { %v148_v56 = vsub.f32 %v142_v54, %v146_v53 }
 0x120   :  { %v150_v60 = vmax.f32 %v148_v56, 0.0 }
 0x122   :  { %v1555_v0 = vpop.eup %1554  ;;  %v154_v1 = vadd.f32 1e-08, %v150_v60 }
 0x123   :  { %v156_v19 = vmul.f32 %v1555_v0, %v153_v52  ;;  %vm162_vm3 = vweird.f32 %v1555_v0 }
 0x124   :  { %1556 = vrsqrt.f32 %v154_v1  ;;  %vm163_vm5 = vmor %vm161_vm4, %vm162_vm3  ;;  %vm171_vm7 = vweird.f32 %v154_v1 }
 0x125   :  { %v157_v24 = vmul.f32 %v1555_v0, %v156_v19 }
 0x127   :  { %v158_v26 = vmul.f32 0.5, %v157_v24  ;;  %v1457_v24 = vld [vmem:[%s1900_s6 + $0x8] sm:$0xf0] }
 0x128   :  { %v1460_v28 = vor.u32 %v1538_v23, %v1457_v24 }
 0x129   :  { %v159_v31 = vsub.f32 1.5, %v158_v26 }
 0x12a   :  { %v1557_v33 = vpop.eup %1556 }
 0x12b   :  { %v166_v35 = vmul.f32 %v1557_v33, %v154_v1  ;;  %v160_v36 = vmul.f32 %v1555_v0, %v159_v31  ;;  %vm172_vm6 = vweird.f32 %v1557_v33  ;;  %v1455_v31 = vld [vmem:[%s1900_s6] sm:$0xf] }
 0x12c   :  { %vm173_vm8 = vmor %vm171_vm7, %vm172_vm6 }
 0x12d   :  { %v167_v37 = vmul.f32 %v1557_v33, %v166_v35  ;;  %v164_v40 = vsel %vm163_vm5, %v1555_v0, %v160_v36  ;;  %v1005_v0 = vld [vmem:[%s1897_s3 + $0x8] sm:$0xff]  ;;  %v1456_v35 = vor.u32 %v1539_v32, %v1455_v31 }
 0x12e   :  { %v175_v43 = vmul.f32 %v164_v40, %v151_v41 }
 0x12f   :  { %v168_v39 = vmul.f32 0.5, %v167_v37 }
 0x130   :  { %v224_v47 = vmul.f32 %v1818_v48, %v175_v43  ;;  %v1092_v43 = vld [vmem:[%s1899_s5 + $0x10] sm:$0xff] }
 0x131   :  { %v169_v42 = vsub.f32 1.5, %v168_v39 }
 0x132   :  { %v226_v52 = vadd.f32 %v224_v47, %v218_v38  ;;  %v1553_v38 = vld [vmem:[%s1895_s1 + $0x1] ss:$0 sm:$0xff] }
 0x133   :  { %v170_v44 = vmul.f32 %v1557_v33, %v169_v42 }
 0x135   :  { %v174_v46 = vsel %vm173_vm8, %v1557_v33, %v170_v44  ;;  %v1090_v44 = vld [vmem:[%s1899_s5] sm:$0xff] }
 0x136   :  { %v176_v49 = vmul.f32 %v174_v46, %v152_v45 }
 0x138   :  { %v225_v51 = vmul.f32 %v215_v20, %v176_v49 }
 0x13a   :  { %v227_v53 = vadd.f32 %v225_v51, %v221_v50  ;;  %v1093_v51 = vld [vmem:[%s1899_s5 + $0x18] sm:$0xff] }
 0x13c   :  { %v228_v54 = vpack.c.bf16 %v227_v53, %v226_v52  ;;  %v1091_v52 = vld [vmem:[%s1899_s5 + $0x8] sm:$0xff]  ;;  %s1647_s5 = smov [#allocation7]  }
 0x13d   :  { %s1145_s26 = sshll.u32 %s1647_s5, 4  ;;  %s1146_s26 = int_to_ptr.vmem [resolvable:$true] %s1145_s26 }
 0x13e   :  { %301 = vmatmul.bf16.vlgmr.msra.gmra.mxu2 %v228_v54  ;;  %380 = vmatmul.bf16.vlgmr.msra.gmra.mxu3 %v228_v54 }
 0x13f   :  { %459 = vmatmul.bf16.vlgmr.msrb.gmra.mxu1 %v228_v54  ;;  %538 = vmatmul.bf16.vlgmr.msrb.gmra.mxu0 %v228_v54 }
 0x140   :  { %925 = vmatpush.bf16.msra.mxu2 %v1537_v55  ;;  %1029 = vmatpush.msrb.mxu1 %v1720_v2  ;;  %v1532_v2 = vld [vmem:[#allocation2 + $0x210] sm:$0xff] }
 0x141   :  { %1121 = vmatpush.msrb.mxu0 %v1780_v22 }
 0x142   :  { %1030 = vmatpush.msrb.mxu1 %v1723_v3  ;;  %v1531_v3 = vld [vmem:[#allocation2 + $0x208] sm:$0xff] }
 0x144   :  { %926 = vmatpush.bf16.msra.mxu2 %v1536_v27  ;;  %1031 = vmatpush.msrb.mxu1 %v1725_v4  ;;  %v1530_v4 = vld [vmem:[#allocation2 + $0x200] sm:$0xff] }
 0x146   :  { %1032 = vmatpush.msrb.mxu1 %v1728_v5 }
 0x148   :  { %927 = vmatpush.bf16.msra.mxu2 %v1535_v34  ;;  %1033 = vmatpush.msrb.mxu1 %v1734_v7 }
 0x14a   :  { %1034 = vmatpush.msrb.mxu1 %v1737_v8 }
 0x14c   :  { %928 = vmatpush.bf16.msra.mxu2 %v1534_v6  ;;  %1035 = vmatpush.msrb.mxu1 %v1740_v9 }
 0x14e   :  { %617 = vmatmul.bf16.vlgmr.msrb.gmra.mxu2 %v228_v54  ;;  %696 = vmatmul.bf16.vlgmr.msrb.gmra.mxu3 %v228_v54 }
 0x14f   :  { %775 = vmatmul.bf16.vlgmr.msra.gmra.mxu1 %v228_v54  ;;  %854 = vmatmul.bf16.vlgmr.msra.gmra.mxu0 %v228_v54 }
 0x150   :  { %929 = vmatpush.bf16.msra.mxu2 %v1533_v29  ;;  %1036 = vmatpush.msrb.mxu1 %v1743_v10 }
 0x152   :  { %1037 = vmatpush.msrb.mxu1 %v1746_v11 }
 0x154   :  { %930 = vmatpush.bf16.msra.mxu2 %v1532_v2  ;;  %1038 = vmatpush.msrb.mxu1 %v1749_v12 }
 0x156   :  { %1039 = vmatpush.msrb.mxu1 %v1752_v13 }
 0x158   :  { %931 = vmatpush.bf16.msra.mxu2 %v1531_v3  ;;  %1040 = vmatpush.msrb.mxu1 %v1755_v14 }
 0x15a   :  { %1041 = vmatpush.msrb.mxu1 %v1759_v15 }
 0x15c   :  { %932 = vmatpush.bf16.msra.mxu2 %v1530_v4  ;;  %1042 = vmatpush.msrb.mxu1 %v1762_v16 }
 0x15e   :  { %1043 = vmatpush.msrb.mxu1 %v1765_v17  ;;  %v950_v17 = vld [vmem:[%s1901_s7] sm:$0xff] }
 0x15f   :  { %933 = vmatmul.bf16.vlgmr.msra.gmra.mxu2 %v228_v54  ;;  %954 = vperm.xlu1 %1550, %v950_v17  }
 0x160   :  { %1044 = vmatpush.msrb.mxu1 %v1767_v18  ;;  %v951_v18 = vld [vmem:[%s1901_s7 + $0x8] sm:$0xff]  ;;  %1462 = vmatmul.msk.f32.vlgmr.msrb.gmra.mxu0 %vm182_vm0, %v1090_v44 }
 0x161   :  { %959 = vperm.xlu2 %1551, %v951_v18  }
 0x167   :  { %1009 = vperm.xlu1 %1550, %v1004_v62  }
 0x168   :  { %1463 = vmatmul.msk.f32.gmra.mxu0 %vm182_vm0, %v1091_v52 }
 0x169   :  { %1014 = vperm.xlu2 %1551, %v1005_v0  }
 0x1bb   :  { %v960_v37 = vpop.permute.xlu2 %959 }
 0x1bc   :  { %v460_v5 = vpop.f32.mrf.mxu1  ;;  %v539_v7 = vpop.f32.mrf.mxu0 }
 0x1c1   :  { %v302_v8 = vpop.f32.mrf.mxu2  ;;  %v381_v9 = vpop.f32.mrf.mxu3 }
 0x1c3   :  { %v1015_v49 = vpop.permute.xlu2 %1014 }
 0x1c4   :  { %v462_v10 = vpop.f32.mrf.mxu1  ;;  %v541_v11 = vpop.f32.mrf.mxu0  ;;  %v1018_v27 = vmul.f32 %v1553_v38, %v1015_v49 }
 0x1c5   :  { %v942_v20 = vpack.c.bf16 %v541_v11, %v539_v7  ;;  %v941_v21 = vpack.c.bf16 %v462_v10, %v460_v5 }
 0x1c9   :  { %v304_v12 = vpop.f32.mrf.mxu2  ;;  %v383_v13 = vpop.f32.mrf.mxu3 }
 0x1ca   :  { %v940_v30 = vpack.c.bf16 %v383_v13, %v381_v9  ;;  %v939_v33 = vpack.c.bf16 %v304_v12, %v302_v8 }
 0x1cc   :  { %v776_v48 = vpop.f32.mrf.mxu1  ;;  %v855_v14 = vpop.f32.mrf.mxu0 }
 0x1d1   :  { %v618_v56 = vpop.f32.mrf.mxu2  ;;  %v697_v15 = vpop.f32.mrf.mxu3 }
 0x1d2   :  { %v955_v36 = vpop.permute.xlu1 %954 }
 0x1d4   :  { %v857_v57 = vpop.f32.mrf.mxu0  ;;  %v778_v16 = vpop.f32.mrf.mxu1 }
 0x1d5   :  { %v946_v58 = vpack.c.bf16 %v857_v57, %v855_v14  ;;  %v945_v59 = vpack.c.bf16 %v778_v16, %v776_v48 }
 0x1d7   :  { %975 = vmatpush.bf16.msra.mxu3 %v946_v58 }
 0x1d9   :  { %v620_v60 = vpop.f32.mrf.mxu2  ;;  %v699_v61 = vpop.f32.mrf.mxu3 }
 0x1da   :  { %v944_v63 = vpack.c.bf16 %v699_v61, %v697_v15  ;;  %v943_v1 = vpack.c.bf16 %v620_v60, %v618_v56  ;;  %v1010_v39 = vpop.permute.xlu1 %1009 }
 0x1db   :  { %976 = vmatpush.bf16.msra.mxu3 %v945_v59 }
 0x1dd   :  { %v1123_v62 = vpop.f32.mrf.mxu0 }
 0x1df   :  { %977 = vmatpush.bf16.msra.mxu3 %v944_v63 }
 0x1e2   :  { %v934_v19 = vpop.f32.mrf.mxu2 }
 0x1e3   :  { %978 = vmatpush.bf16.msra.mxu3 %v943_v1 }
 0x1e5   :  { %v1126_v31 = vpop.f32.mrf.mxu0 }
 0x1e7   :  { %979 = vmatpush.bf16.msra.mxu3 %v942_v20 }
 0x1ea   :  { %v936_v25 = vpop.f32.mrf.mxu2 }
 0x1eb   :  { %v947_v26 = vpack.c.bf16 %v936_v25, %v934_v19  ;;  %980 = vmatpush.bf16.msra.mxu3 %v941_v21 }
 0x1ed   :  { %996 = vmatpush.bf16.msrb.mxu2 %v947_v26 }
 0x1ef   :  { %981 = vmatpush.bf16.msra.mxu3 %v940_v30 }
 0x1f0   :  { %1461 = vmatmul.msk.bf16.vlgmr.msrb.gmra.mxu2 %vm971_vm9, %v1460_v28 }
 0x1f3   :  { %982 = vmatpush.bf16.msra.mxu3 %v939_v33 }
 0x1f6   :  { %983 = vmatmul.bf16.vlgmr.msra.gmra.mxu3 %v1456_v35 }
 0x1f7   :  { %1540 = vmatpush.msrb.mxu3 %v1780_v22  ;;  %v1017_v22 = vmul.f32 %v1553_v38, %v1010_v39 }
 0x206   :  { %1464 = vmatmul.msk.f32.vlgmr.msrb.gmra.mxu3 %vm182_vm0, %v1092_v43 }
 0x20e   :  { %1465 = vmatmul.msk.f32.gmra.mxu3 %vm182_vm0, %v1093_v51 }
 0x273   :  { %v998_v40 = vpop.f32.mrf.mxu2 }
 0x279   :  { %v984_v41 = vpop.f32.mrf.mxu3 }
 0x27a   :  { %v985_v42 = vadd.f32 %v984_v41, %v955_v36 }
 0x27b   :  { %v1000_v55 = vpop.f32.mrf.mxu2 }
 0x27c   :  { %v999_v45 = vadd.f32 %v998_v40, %v985_v42 }
 0x27e   :  { %v1019_v46 = vadd.f32 %v1017_v22, %v999_v45 }
 0x280   :  { %vm1021_vm10 = vcmp.ge.f32.partialorder %v1019_v46, 0.0  ;;  %v1023_v47 = vmul.f32 0.2, %v1019_v46 }
 0x281   :  { %v986_v50 = vpop.f32.mrf.mxu3 }
 0x282   :  { %v987_v53 = vadd.f32 %v986_v50, %v960_v37  ;;  %v1025_v54 = vsel %vm1021_vm10, %v1019_v46, %v1023_v47 }
 0x283   :  { %1045 = vmatmul.f32.vlgmr.msrb.gmra.mxu1 %v1025_v54  ;;  %v1027_v3 = vmul.f32 %v1025_v54, %v1025_v54 }
 0x284   :  { %v1001_v34 = vadd.f32 %v1000_v55, %v987_v53 }
 0x286   :  { %v1020_v6 = vadd.f32 %v1018_v27, %v1001_v34 }
 0x288   :  { %vm1022_vm11 = vcmp.ge.f32.partialorder %v1020_v6, 0.0  ;;  %v1024_v29 = vmul.f32 0.2, %v1020_v6 }
 0x289   :  { %v1129_v19 = vpop.f32.mrf.mxu3 }
 0x28a   :  { %v1026_v2 = vsel %vm1022_vm11, %v1020_v6, %v1024_v29 }
 0x28b   :  { %1048 = vmatmul.f32.gmra.mxu1 %v1026_v2  ;;  %v1028_v4 = vmul.f32 %v1026_v2, %v1026_v2 }
 0x291   :  { %v1132_v33 = vpop.f32.mrf.mxu3 }
 0x293   :  { %1051 = vmatmul.f32.gmra.mxu1 %v1027_v3 }
 0x29b   :  { %1054 = vmatmul.f32.gmra.mxu1 %v1028_v4 }
 0x300   :  { %v1046_v5 = vpop.f32.mrf.mxu1 }
 0x301   :  { %v1058_v8 = vmul.f32 %v1046_v5, %v1046_v5  ;;  %v1064_v63 = vsub.f32 %v1025_v54, %v1046_v5 }
 0x308   :  { %v1049_v7 = vpop.f32.mrf.mxu1 }
 0x309   :  { %v1059_v13 = vmul.f32 %v1049_v7, %v1049_v7  ;;  %v1065_v28 = vsub.f32 %v1026_v2, %v1049_v7 }
 0x310   :  { %v1052_v9 = vpop.f32.mrf.mxu1 }
 0x311   :  { %v1060_v10 = vsub.f32 %v1052_v9, %v1058_v8 }
 0x313   :  { %v1062_v11 = vmax.f32 %v1060_v10, 0.0 }
 0x315   :  { %v1066_v12 = vadd.f32 1e-08, %v1062_v11 }
 0x317   :  { %1558 = vrsqrt.f32 %v1066_v12  ;;  %vm1074_vm13 = vweird.f32 %v1066_v12 }
 0x318   :  { %v1055_v48 = vpop.f32.mrf.mxu1 }
 0x319   :  { %v1061_v14 = vsub.f32 %v1055_v48, %v1059_v13 }
 0x31b   :  { %v1063_v56 = vmax.f32 %v1061_v14, 0.0 }
 0x31d   :  { %v1559_v15 = vpop.eup %1558  ;;  %v1067_v57 = vadd.f32 1e-08, %v1063_v56 }
 0x31e   :  { %v1069_v58 = vmul.f32 %v1559_v15, %v1066_v12  ;;  %vm1075_vm12 = vweird.f32 %v1559_v15 }
 0x31f   :  { %1560 = vrsqrt.f32 %v1067_v57  ;;  %vm1076_vm14 = vmor %vm1074_vm13, %vm1075_vm12  ;;  %vm1084_vm0 = vweird.f32 %v1067_v57 }
 0x320   :  { %v1070_v16 = vmul.f32 %v1559_v15, %v1069_v58 }
 0x322   :  { %v1071_v17 = vmul.f32 0.5, %v1070_v16 }
 0x324   :  { %v1072_v18 = vsub.f32 1.5, %v1071_v17 }
 0x325   :  { %v1561_v59 = vpop.eup %1560 }
 0x326   :  { %v1079_v60 = vmul.f32 %v1561_v59, %v1067_v57  ;;  %v1073_v61 = vmul.f32 %v1559_v15, %v1072_v18  ;;  %vm1085_vm15 = vweird.f32 %v1561_v59 }
 0x327   :  { %vm1086_vm1 = vmor %vm1084_vm0, %vm1085_vm15 }
 0x328   :  { %v1080_v0 = vmul.f32 %v1561_v59, %v1079_v60  ;;  %v1077_v1 = vsel %vm1076_vm14, %v1559_v15, %v1073_v61 }
 0x329   :  { %v1088_v20 = vmul.f32 %v1077_v1, %v1064_v63 }
 0x32a   :  { %v1081_v21 = vmul.f32 0.5, %v1080_v0 }
 0x32b   :  { %v1135_v23 = vmul.f32 %v1123_v62, %v1088_v20 }
 0x32c   :  { %v1082_v24 = vsub.f32 1.5, %v1081_v21 }
 0x32d   :  { %v1137_v25 = vadd.f32 %v1135_v23, %v1129_v19 }
 0x32e   :  { %v1083_v26 = vmul.f32 %v1561_v59, %v1082_v24 }
 0x32f   :  { %1139 = vst [vmem:[#allocation7] sm:$0xff] %v1137_v25 }
 0x330   :  { %v1087_v30 = vsel %vm1086_vm1, %v1561_v59, %v1083_v26 }
 0x331   :  { %v1089_v32 = vmul.f32 %v1087_v30, %v1065_v28 }
 0x333   :  { %v1136_v35 = vmul.f32 %v1126_v31, %v1089_v32 }
 0x335   :  { %v1138_v36 = vadd.f32 %v1136_v35, %v1132_v33 }
 0x337   :  { %1140 = vst [vmem:[#allocation7 + $0x8] sm:$0xff] %v1138_v36 }
 0x338   :  { %1153 = dma.vmem_to_hbm [thread:$0]  %s1146_s26, 256, %s1148_s28, [#allocation4], %s1644_s29, %s1644_s29, %s1645_s30  }
 0x339   :  { %1638 = dma.done.wait [#allocation4], 256  }
 0x33a   :  { %1639 = vsyncadd [#allocation4], 4294967040 }
 0x33b   :  { %1158 = vsyncpa [#allocation3], 1 }
 0x33c   :  { %1159 = vsyncpa [#allocation6], 1 }
 0x33d   :  { %1160 = vsyncpa [#allocation4], 1 }

</bundles_post_ra>
